<compile_context>
chip_gen: v7x
topology: tpu7x:2x2x1
jax: 0.10.0
libtpu: 0.0.40
codegen_flags: <defaults>
</compile_context>

<pallas_src>
import functools

import jax
import jax.numpy as jnp
from jax.experimental import pallas as pl
from jax.experimental.pallas import tpu as pltpu


# ----------------------------------------------------------------------------
# In-kernel building block: Conv1d(k=3, pad=1) + ReLU + MaxPool1d(2, 2)
# operating on a batch-flattened (B*cur_len, Cin) slab.
# ----------------------------------------------------------------------------
def _conv_relu_pool(h, w_ref, b_ref, cur_len):
    m = h.shape[0]                         # m = batch * cur_len (rows are batch-major)
    # position of each row inside its own sequence segment
    row = jax.lax.broadcasted_iota(jnp.int32, (m, 1), 0)
    pos = row % cur_len
    # Shifted copies via XLU roll (pltpu.roll matches jnp.roll semantics:
    # result[i] = h[i - shift]).  Zero the rows that wrapped across a
    # sequence (= batch) boundary -> exact Conv1d zero padding, and no
    # cross-batch contamination from the flattened layout.
    h_prev = jnp.where(pos == 0, 0.0, pltpu.roll(h, shift=1, axis=0))
    h_next = jnp.where(pos == cur_len - 1, 0.0, pltpu.roll(h, shift=m - 1, axis=0))
    # Three K=Cin matmuls accumulated in fp32 (MXU), instead of im2col.
    y = (jnp.dot(h_prev, w_ref[0], preferred_element_type=jnp.float32)
         + jnp.dot(h, w_ref[1], preferred_element_type=jnp.float32)
         + jnp.dot(h_next, w_ref[2], preferred_element_type=jnp.float32)
         + b_ref[...])
    y = jnp.maximum(y, 0.0)                                    # ReLU
    c_out = y.shape[-1]
    # MaxPool1d(2, 2): cur_len is even, so row pairs never straddle a batch.
    return jnp.max(y.reshape(m // 2, 2, c_out), axis=1)


# ----------------------------------------------------------------------------
# Fused kernel: conv stack + attention + global-avg-pool + MLP head.
# ----------------------------------------------------------------------------
def _cnn_fused_kernel(x_ref, cw1_ref, cb1_ref, cw2_ref, cb2_ref,
                      cw3_ref, cb3_ref, aw_ref, ab_ref,
                      w1_ref, b1_ref, w2_ref, b2_ref, w3_ref, b3_ref,
                      out_ref, attw_ref, *, batch, seq_len):
    x = x_ref[...]                                             # (B*L, Cin)
    h = _conv_relu_pool(x, cw1_ref, cb1_ref, seq_len)          # (B*L/2, 64)
    h = _conv_relu_pool(h, cw2_ref, cb2_ref, seq_len // 2)     # (B*L/4, 128)
    h = _conv_relu_pool(h, cw3_ref, cb3_ref, seq_len // 4)     # (B*L/8, H)

    lp = seq_len // 8
    hidden = h.shape[-1]

    # Attention: Linear(H, 1) -> softmax over the sequence.
    scores = (jnp.dot(h, aw_ref[...], preferred_element_type=jnp.float32)
              + ab_ref[...])                                   # (B*Lp, 1)
    scores = scores.reshape(batch, lp, 1)                      # (B, Lp, 1)
    s_max = jnp.max(scores, axis=1, keepdims=True)
    e = jnp.exp(scores - s_max)
    w_att = e / jnp.sum(e, axis=1, keepdims=True)              # (B, Lp, 1)
    attw_ref[...] = w_att.astype(attw_ref.dtype)               # 4 floats total

    # Elementwise reweight + AdaptiveAvgPool1d(1)  ==  mean over seq of w*x.
    f = h.reshape(batch, lp, hidden)                           # (B, Lp, H)
    pooled = jnp.sum(f * w_att, axis=1) * (1.0 / lp)           # (B, H)

    # FC head, batched over B as a single matmul chain.
    h1 = jnp.maximum(
        jnp.dot(pooled, w1_ref[...], preferred_element_type=jnp.float32)
        + b1_ref[...], 0.0)                                    # (B, 64)
    h2 = jnp.maximum(
        jnp.dot(h1, w2_ref[...], preferred_element_type=jnp.float32)
        + b2_ref[...], 0.0)                                    # (B, 32)
    out = jnp.dot(h2, w3_ref[...], preferred_element_type=jnp.float32) + b3_ref[...]
    out_ref[...] = out.astype(out_ref.dtype)                   # (B, Out)


# ----------------------------------------------------------------------------
# Wrapper: single pallas_call, all operands fully resident in VMEM.
# ----------------------------------------------------------------------------
@jax.jit
def cnn_model_forward(x, params):
    # x: (B, L, input_channels)  (PyTorch forward permutes to NCL itself;
    # here we stay channel-last the whole way).
    B, L, Cin = x.shape
    assert L % 8 == 0, "three MaxPool1d(2,2) stages require L % 8 == 0"
    out_size = params["w3"].shape[-1]
    lp = L // 8

    x_flat = x.reshape(B * L, Cin)                             # batch folded into M
    kern = functools.partial(_cnn_fused_kernel, batch=B, seq_len=L)

    out, attw = pl.pallas_call(
        kern,
        out_shape=(
            jax.ShapeDtypeStruct((B, out_size), jnp.float32),
            jax.ShapeDtypeStruct((B, lp, 1), jnp.float32),
        ),
    )(x_flat,
      params["cw1"], params["cb1"],
      params["cw2"], params["cb2"],
      params["cw3"], params["cb3"],
      params["aw"], params["ab"],
      params["w1"], params["b1"],
      params["w2"], params["b2"],
      params["w3"], params["b3"])
    return out, attw


# ----------------------------------------------------------------------------
# Parameter construction (deterministic)
# ----------------------------------------------------------------------------
def init_params(key, input_channels, hidden_size, output_size):
    ks = jax.random.split(key, 16)

    def dense(k, fan_in, shape):
        return jax.random.normal(k, shape, jnp.float32) / jnp.sqrt(fan_in)

    p = {}
    # conv weights stored as (K=3, Cin, Cout); biases as (1, Cout)
    p["cw1"] = dense(ks[0], 3 * input_channels, (3, input_channels, 64))
    p["cb1"] = dense(ks[1], 3 * input_channels, (1, 64))
    p["cw2"] = dense(ks[2], 3 * 64, (3, 64, 128))
    p["cb2"] = dense(ks[3], 3 * 64, (1, 128))
    p["cw3"] = dense(ks[4], 3 * 128, (3, 128, hidden_size))
    p["cb3"] = dense(ks[5], 3 * 128, (1, hidden_size))
    # attention Linear(hidden_size, 1)
    p["aw"] = dense(ks[6], hidden_size, (hidden_size, 1))
    p["ab"] = dense(ks[7], hidden_size, (1, 1))
    # fc head
    p["w1"] = dense(ks[8], hidden_size, (hidden_size, 64))
    p["b1"] = dense(ks[9], hidden_size, (1, 64))
    p["w2"] = dense(ks[10], 64, (64, 32))
    p["b2"] = dense(ks[11], 64, (1, 32))
    p["w3"] = dense(ks[12], 32, (32, output_size))
    p["b3"] = dense(ks[13], 32, (1, output_size))
    return p


if __name__ == "__main__":
    B, L, C_IN = 2, 16, 4
    HIDDEN, OUT = 32, 8

    key = jax.random.PRNGKey(0)
    k_x, k_p = jax.random.split(key)
    x = jax.random.normal(k_x, (B, L, C_IN), jnp.float32)
    params = init_params(k_p, C_IN, HIDDEN, OUT)

    y, attention_weights = cnn_model_forward(x, params)
    jax.block_until_ready((y, attention_weights))

    assert y.shape == (B, OUT)
    assert attention_weights.shape == (B, L // 8, 1)
    print("KERNEL_OK")
</pallas_src>

<mosaic_0001>
module attributes {stable_mosaic.version = 11 : i64} {
  func.func @_cnn_fused_kernel(%arg0: memref<32x4xf32, #tpu.memory_space<vmem>>, %arg1: memref<3x4x64xf32, #tpu.memory_space<vmem>>, %arg2: memref<1x64xf32, #tpu.memory_space<vmem>>, %arg3: memref<3x64x128xf32, #tpu.memory_space<vmem>>, %arg4: memref<1x128xf32, #tpu.memory_space<vmem>>, %arg5: memref<3x128x32xf32, #tpu.memory_space<vmem>>, %arg6: memref<1x32xf32, #tpu.memory_space<vmem>>, %arg7: memref<32x1xf32, #tpu.memory_space<vmem>>, %arg8: memref<1x1xf32, #tpu.memory_space<vmem>>, %arg9: memref<32x64xf32, #tpu.memory_space<vmem>>, %arg10: memref<1x64xf32, #tpu.memory_space<vmem>>, %arg11: memref<64x32xf32, #tpu.memory_space<vmem>>, %arg12: memref<1x32xf32, #tpu.memory_space<vmem>>, %arg13: memref<32x8xf32, #tpu.memory_space<vmem>>, %arg14: memref<1x8xf32, #tpu.memory_space<vmem>>, %arg15: memref<2x8xf32, #tpu.memory_space<vmem>>, %arg16: memref<2x2x1xf32, #tpu.memory_space<vmem>>) attributes {dimension_semantics = [], scalar_prefetch = 0 : i64, scratch_operands = 0 : i64, tpu.core_type = #tpu.core_type<tc>} {
    %c0 = arith.constant 0 : index
    %c0_0 = arith.constant 0 : index
    %0 = vector.load %arg0[%c0, %c0_0] : memref<32x4xf32, #tpu.memory_space<vmem>>, vector<32x4xf32>
    %1 = tpu.iota {dimensions = array<i32: 0>} : vector<32x1xi32>
    %c16_i32 = arith.constant 16 : i32
    %c0_i32 = arith.constant 0 : i32
    %2 = arith.cmpi eq, %c16_i32, %c0_i32 : i32
    %c1_i32 = arith.constant 1 : i32
    %3 = arith.select %2, %c1_i32, %c16_i32 : i32
    %4 = vector.broadcast %3 : i32 to vector<32x1xi32>
    %5 = arith.remsi %1, %4 : vector<32x1xi32>
    %c0_i32_1 = arith.constant 0 : i32
    %6 = vector.broadcast %c0_i32_1 : i32 to vector<32x1xi32>
    %7 = arith.cmpi ne, %5, %6 : vector<32x1xi32>
    %c0_i32_2 = arith.constant 0 : i32
    %8 = vector.broadcast %c0_i32_2 : i32 to vector<32x1xi32>
    %9 = arith.cmpi slt, %5, %8 : vector<32x1xi32>
    %c0_i32_3 = arith.constant 0 : i32
    %10 = arith.cmpi slt, %3, %c0_i32_3 : i32
    %11 = vector.broadcast %10 : i1 to vector<32x1xi1>
    %12 = vector.broadcast %11 : vector<32x1xi1> to vector<32x1xi1>
    %13 = arith.xori %9, %12 : vector<32x1xi1>
    %14 = arith.andi %13, %7 : vector<32x1xi1>
    %15 = vector.broadcast %3 : i32 to vector<32x1xi32>
    %16 = arith.addi %5, %15 : vector<32x1xi32>
    %17 = arith.select %14, %16, %5 : vector<32x1xi1>, vector<32x1xi32>
    %c0_i32_4 = arith.constant 0 : i32
    %18 = vector.broadcast %c0_i32_4 : i32 to vector<32x1xi32>
    %19 = arith.cmpi eq, %17, %18 : vector<32x1xi32>
    %c1_i32_5 = arith.constant 1 : i32
    %20 = tpu.dynamic_rotate %0 by %c1_i32_5 dim 0 : vector<32x4xf32>, i32 -> vector<32x4xf32>
    %cst = arith.constant 0.000000e+00 : f32
    %21 = vector.shape_cast %19 : vector<32x1xi1> to vector<32x1xi1>
    %22 = vector.broadcast %21 : vector<32x1xi1> to vector<32x4xi1>
    %23 = vector.broadcast %cst : f32 to vector<32x4xf32>
    %24 = arith.select %22, %23, %20 : vector<32x4xi1>, vector<32x4xf32>
    %c15_i32 = arith.constant 15 : i32
    %25 = vector.broadcast %c15_i32 : i32 to vector<32x1xi32>
    %26 = arith.cmpi eq, %17, %25 : vector<32x1xi32>
    %c31_i32 = arith.constant 31 : i32
    %27 = tpu.dynamic_rotate %0 by %c31_i32 dim 0 : vector<32x4xf32>, i32 -> vector<32x4xf32>
    %cst_6 = arith.constant 0.000000e+00 : f32
    %28 = vector.shape_cast %26 : vector<32x1xi1> to vector<32x1xi1>
    %29 = vector.broadcast %28 : vector<32x1xi1> to vector<32x4xi1>
    %30 = vector.broadcast %cst_6 : f32 to vector<32x4xf32>
    %31 = arith.select %29, %30, %27 : vector<32x4xi1>, vector<32x4xf32>
    %c0_7 = arith.constant 0 : index
    %c0_8 = arith.constant 0 : index
    %c0_9 = arith.constant 0 : index
    %32 = vector.load %arg1[%c0_7, %c0_8, %c0_9] : memref<3x4x64xf32, #tpu.memory_space<vmem>>, vector<1x4x64xf32>
    %33 = vector.shape_cast %32 : vector<1x4x64xf32> to vector<4x64xf32>
    %cst_10 = arith.constant dense<0.000000e+00> : vector<32x64xf32>
    %34 = tpu.matmul %24, %33, %cst_10 {dimension_numbers = #tpu.dot_dimension_numbers<[1], [0], [0], [1], [0, 0, 1, 1], [], []>} : vector<32x4xf32>, vector<4x64xf32>, vector<32x64xf32> -> vector<32x64xf32>
    %c1 = arith.constant 1 : index
    %c0_11 = arith.constant 0 : index
    %c0_12 = arith.constant 0 : index
    %35 = vector.load %arg1[%c1, %c0_11, %c0_12] : memref<3x4x64xf32, #tpu.memory_space<vmem>>, vector<1x4x64xf32>
    %36 = vector.shape_cast %35 : vector<1x4x64xf32> to vector<4x64xf32>
    %cst_13 = arith.constant dense<0.000000e+00> : vector<32x64xf32>
    %37 = tpu.matmul %0, %36, %cst_13 {dimension_numbers = #tpu.dot_dimension_numbers<[1], [0], [0], [1], [0, 0, 1, 1], [], []>} : vector<32x4xf32>, vector<4x64xf32>, vector<32x64xf32> -> vector<32x64xf32>
    %38 = arith.addf %34, %37 : vector<32x64xf32>
    %c2 = arith.constant 2 : index
    %c0_14 = arith.constant 0 : index
    %c0_15 = arith.constant 0 : index
    %39 = vector.load %arg1[%c2, %c0_14, %c0_15] : memref<3x4x64xf32, #tpu.memory_space<vmem>>, vector<1x4x64xf32>
    %40 = vector.shape_cast %39 : vector<1x4x64xf32> to vector<4x64xf32>
    %cst_16 = arith.constant dense<0.000000e+00> : vector<32x64xf32>
    %41 = tpu.matmul %31, %40, %cst_16 {dimension_numbers = #tpu.dot_dimension_numbers<[1], [0], [0], [1], [0, 0, 1, 1], [], []>} : vector<32x4xf32>, vector<4x64xf32>, vector<32x64xf32> -> vector<32x64xf32>
    %42 = arith.addf %38, %41 : vector<32x64xf32>
    %c0_17 = arith.constant 0 : index
    %c0_18 = arith.constant 0 : index
    %43 = vector.load %arg2[%c0_17, %c0_18] : memref<1x64xf32, #tpu.memory_space<vmem>>, vector<1x64xf32>
    %44 = vector.broadcast %43 : vector<1x64xf32> to vector<32x64xf32>
    %45 = arith.addf %42, %44 : vector<32x64xf32>
    %cst_19 = arith.constant 0.000000e+00 : f32
    %46 = vector.broadcast %cst_19 : f32 to vector<32x64xf32>
    %47 = arith.maximumf %45, %46 : vector<32x64xf32>
    %48 = vector.shape_cast %47 : vector<32x64xf32> to vector<16x2x64xf32>
    %cst_20 = arith.constant dense<0xFF800000> : vector<16x64xf32>
    %49 = vector.multi_reduction <maximumf>, %48, %cst_20 [1] : vector<16x2x64xf32> to vector<16x64xf32>
    %50 = tpu.iota {dimensions = array<i32: 0>} : vector<16x1xi32>
    %c8_i32 = arith.constant 8 : i32
    %c0_i32_21 = arith.constant 0 : i32
    %51 = arith.cmpi eq, %c8_i32, %c0_i32_21 : i32
    %c1_i32_22 = arith.constant 1 : i32
    %52 = arith.select %51, %c1_i32_22, %c8_i32 : i32
    %53 = vector.broadcast %52 : i32 to vector<16x1xi32>
    %54 = arith.remsi %50, %53 : vector<16x1xi32>
    %c0_i32_23 = arith.constant 0 : i32
    %55 = vector.broadcast %c0_i32_23 : i32 to vector<16x1xi32>
    %56 = arith.cmpi ne, %54, %55 : vector<16x1xi32>
    %c0_i32_24 = arith.constant 0 : i32
    %57 = vector.broadcast %c0_i32_24 : i32 to vector<16x1xi32>
    %58 = arith.cmpi slt, %54, %57 : vector<16x1xi32>
    %c0_i32_25 = arith.constant 0 : i32
    %59 = arith.cmpi slt, %52, %c0_i32_25 : i32
    %60 = vector.broadcast %59 : i1 to vector<16x1xi1>
    %61 = vector.broadcast %60 : vector<16x1xi1> to vector<16x1xi1>
    %62 = arith.xori %58, %61 : vector<16x1xi1>
    %63 = arith.andi %62, %56 : vector<16x1xi1>
    %64 = vector.broadcast %52 : i32 to vector<16x1xi32>
    %65 = arith.addi %54, %64 : vector<16x1xi32>
    %66 = arith.select %63, %65, %54 : vector<16x1xi1>, vector<16x1xi32>
    %c0_i32_26 = arith.constant 0 : i32
    %67 = vector.broadcast %c0_i32_26 : i32 to vector<16x1xi32>
    %68 = arith.cmpi eq, %66, %67 : vector<16x1xi32>
    %c1_i32_27 = arith.constant 1 : i32
    %69 = tpu.dynamic_rotate %49 by %c1_i32_27 dim 0 : vector<16x64xf32>, i32 -> vector<16x64xf32>
    %cst_28 = arith.constant 0.000000e+00 : f32
    %70 = vector.shape_cast %68 : vector<16x1xi1> to vector<16x1xi1>
    %71 = vector.broadcast %70 : vector<16x1xi1> to vector<16x64xi1>
    %72 = vector.broadcast %cst_28 : f32 to vector<16x64xf32>
    %73 = arith.select %71, %72, %69 : vector<16x64xi1>, vector<16x64xf32>
    %c7_i32 = arith.constant 7 : i32
    %74 = vector.broadcast %c7_i32 : i32 to vector<16x1xi32>
    %75 = arith.cmpi eq, %66, %74 : vector<16x1xi32>
    %c15_i32_29 = arith.constant 15 : i32
    %76 = tpu.dynamic_rotate %49 by %c15_i32_29 dim 0 : vector<16x64xf32>, i32 -> vector<16x64xf32>
    %cst_30 = arith.constant 0.000000e+00 : f32
    %77 = vector.shape_cast %75 : vector<16x1xi1> to vector<16x1xi1>
    %78 = vector.broadcast %77 : vector<16x1xi1> to vector<16x64xi1>
    %79 = vector.broadcast %cst_30 : f32 to vector<16x64xf32>
    %80 = arith.select %78, %79, %76 : vector<16x64xi1>, vector<16x64xf32>
    %c0_31 = arith.constant 0 : index
    %c0_32 = arith.constant 0 : index
    %c0_33 = arith.constant 0 : index
    %81 = vector.load %arg3[%c0_31, %c0_32, %c0_33] : memref<3x64x128xf32, #tpu.memory_space<vmem>>, vector<1x64x128xf32>
    %82 = vector.shape_cast %81 : vector<1x64x128xf32> to vector<64x128xf32>
    %cst_34 = arith.constant dense<0.000000e+00> : vector<16x128xf32>
    %83 = tpu.matmul %73, %82, %cst_34 {dimension_numbers = #tpu.dot_dimension_numbers<[1], [0], [0], [1], [0, 0, 1, 1], [], []>} : vector<16x64xf32>, vector<64x128xf32>, vector<16x128xf32> -> vector<16x128xf32>
    %c1_35 = arith.constant 1 : index
    %c0_36 = arith.constant 0 : index
    %c0_37 = arith.constant 0 : index
    %84 = vector.load %arg3[%c1_35, %c0_36, %c0_37] : memref<3x64x128xf32, #tpu.memory_space<vmem>>, vector<1x64x128xf32>
    %85 = vector.shape_cast %84 : vector<1x64x128xf32> to vector<64x128xf32>
    %cst_38 = arith.constant dense<0.000000e+00> : vector<16x128xf32>
    %86 = tpu.matmul %49, %85, %cst_38 {dimension_numbers = #tpu.dot_dimension_numbers<[1], [0], [0], [1], [0, 0, 1, 1], [], []>} : vector<16x64xf32>, vector<64x128xf32>, vector<16x128xf32> -> vector<16x128xf32>
    %87 = arith.addf %83, %86 : vector<16x128xf32>
    %c2_39 = arith.constant 2 : index
    %c0_40 = arith.constant 0 : index
    %c0_41 = arith.constant 0 : index
    %88 = vector.load %arg3[%c2_39, %c0_40, %c0_41] : memref<3x64x128xf32, #tpu.memory_space<vmem>>, vector<1x64x128xf32>
    %89 = vector.shape_cast %88 : vector<1x64x128xf32> to vector<64x128xf32>
    %cst_42 = arith.constant dense<0.000000e+00> : vector<16x128xf32>
    %90 = tpu.matmul %80, %89, %cst_42 {dimension_numbers = #tpu.dot_dimension_numbers<[1], [0], [0], [1], [0, 0, 1, 1], [], []>} : vector<16x64xf32>, vector<64x128xf32>, vector<16x128xf32> -> vector<16x128xf32>
    %91 = arith.addf %87, %90 : vector<16x128xf32>
    %c0_43 = arith.constant 0 : index
    %c0_44 = arith.constant 0 : index
    %92 = vector.load %arg4[%c0_43, %c0_44] : memref<1x128xf32, #tpu.memory_space<vmem>>, vector<1x128xf32>
    %93 = vector.broadcast %92 : vector<1x128xf32> to vector<16x128xf32>
    %94 = arith.addf %91, %93 : vector<16x128xf32>
    %cst_45 = arith.constant 0.000000e+00 : f32
    %95 = vector.broadcast %cst_45 : f32 to vector<16x128xf32>
    %96 = arith.maximumf %94, %95 : vector<16x128xf32>
    %97 = vector.shape_cast %96 : vector<16x128xf32> to vector<8x2x128xf32>
    %cst_46 = arith.constant dense<0xFF800000> : vector<8x128xf32>
    %98 = vector.multi_reduction <maximumf>, %97, %cst_46 [1] : vector<8x2x128xf32> to vector<8x128xf32>
    %99 = tpu.iota {dimensions = array<i32: 0>} : vector<8x1xi32>
    %c4_i32 = arith.constant 4 : i32
    %c0_i32_47 = arith.constant 0 : i32
    %100 = arith.cmpi eq, %c4_i32, %c0_i32_47 : i32
    %c1_i32_48 = arith.constant 1 : i32
    %101 = arith.select %100, %c1_i32_48, %c4_i32 : i32
    %102 = vector.broadcast %101 : i32 to vector<8x1xi32>
    %103 = arith.remsi %99, %102 : vector<8x1xi32>
    %c0_i32_49 = arith.constant 0 : i32
    %104 = vector.broadcast %c0_i32_49 : i32 to vector<8x1xi32>
    %105 = arith.cmpi ne, %103, %104 : vector<8x1xi32>
    %c0_i32_50 = arith.constant 0 : i32
    %106 = vector.broadcast %c0_i32_50 : i32 to vector<8x1xi32>
    %107 = arith.cmpi slt, %103, %106 : vector<8x1xi32>
    %c0_i32_51 = arith.constant 0 : i32
    %108 = arith.cmpi slt, %101, %c0_i32_51 : i32
    %109 = vector.broadcast %108 : i1 to vector<8x1xi1>
    %110 = vector.broadcast %109 : vector<8x1xi1> to vector<8x1xi1>
    %111 = arith.xori %107, %110 : vector<8x1xi1>
    %112 = arith.andi %111, %105 : vector<8x1xi1>
    %113 = vector.broadcast %101 : i32 to vector<8x1xi32>
    %114 = arith.addi %103, %113 : vector<8x1xi32>
    %115 = arith.select %112, %114, %103 : vector<8x1xi1>, vector<8x1xi32>
    %c0_i32_52 = arith.constant 0 : i32
    %116 = vector.broadcast %c0_i32_52 : i32 to vector<8x1xi32>
    %117 = arith.cmpi eq, %115, %116 : vector<8x1xi32>
    %c1_i32_53 = arith.constant 1 : i32
    %118 = tpu.dynamic_rotate %98 by %c1_i32_53 dim 0 : vector<8x128xf32>, i32 -> vector<8x128xf32>
    %cst_54 = arith.constant 0.000000e+00 : f32
    %119 = vector.shape_cast %117 : vector<8x1xi1> to vector<8x1xi1>
    %120 = vector.broadcast %119 : vector<8x1xi1> to vector<8x128xi1>
    %121 = vector.broadcast %cst_54 : f32 to vector<8x128xf32>
    %122 = arith.select %120, %121, %118 : vector<8x128xi1>, vector<8x128xf32>
    %c3_i32 = arith.constant 3 : i32
    %123 = vector.broadcast %c3_i32 : i32 to vector<8x1xi32>
    %124 = arith.cmpi eq, %115, %123 : vector<8x1xi32>
    %c7_i32_55 = arith.constant 7 : i32
    %125 = tpu.dynamic_rotate %98 by %c7_i32_55 dim 0 : vector<8x128xf32>, i32 -> vector<8x128xf32>
    %cst_56 = arith.constant 0.000000e+00 : f32
    %126 = vector.shape_cast %124 : vector<8x1xi1> to vector<8x1xi1>
    %127 = vector.broadcast %126 : vector<8x1xi1> to vector<8x128xi1>
    %128 = vector.broadcast %cst_56 : f32 to vector<8x128xf32>
    %129 = arith.select %127, %128, %125 : vector<8x128xi1>, vector<8x128xf32>
    %c0_57 = arith.constant 0 : index
    %c0_58 = arith.constant 0 : index
    %c0_59 = arith.constant 0 : index
    %130 = vector.load %arg5[%c0_57, %c0_58, %c0_59] : memref<3x128x32xf32, #tpu.memory_space<vmem>>, vector<1x128x32xf32>
    %131 = vector.shape_cast %130 : vector<1x128x32xf32> to vector<128x32xf32>
    %cst_60 = arith.constant dense<0.000000e+00> : vector<8x32xf32>
    %132 = tpu.matmul %122, %131, %cst_60 {dimension_numbers = #tpu.dot_dimension_numbers<[1], [0], [0], [1], [0, 0, 1, 1], [], []>} : vector<8x128xf32>, vector<128x32xf32>, vector<8x32xf32> -> vector<8x32xf32>
    %c1_61 = arith.constant 1 : index
    %c0_62 = arith.constant 0 : index
    %c0_63 = arith.constant 0 : index
    %133 = vector.load %arg5[%c1_61, %c0_62, %c0_63] : memref<3x128x32xf32, #tpu.memory_space<vmem>>, vector<1x128x32xf32>
    %134 = vector.shape_cast %133 : vector<1x128x32xf32> to vector<128x32xf32>
    %cst_64 = arith.constant dense<0.000000e+00> : vector<8x32xf32>
    %135 = tpu.matmul %98, %134, %cst_64 {dimension_numbers = #tpu.dot_dimension_numbers<[1], [0], [0], [1], [0, 0, 1, 1], [], []>} : vector<8x128xf32>, vector<128x32xf32>, vector<8x32xf32> -> vector<8x32xf32>
    %136 = arith.addf %132, %135 : vector<8x32xf32>
    %c2_65 = arith.constant 2 : index
    %c0_66 = arith.constant 0 : index
    %c0_67 = arith.constant 0 : index
    %137 = vector.load %arg5[%c2_65, %c0_66, %c0_67] : memref<3x128x32xf32, #tpu.memory_space<vmem>>, vector<1x128x32xf32>
    %138 = vector.shape_cast %137 : vector<1x128x32xf32> to vector<128x32xf32>
    %cst_68 = arith.constant dense<0.000000e+00> : vector<8x32xf32>
    %139 = tpu.matmul %129, %138, %cst_68 {dimension_numbers = #tpu.dot_dimension_numbers<[1], [0], [0], [1], [0, 0, 1, 1], [], []>} : vector<8x128xf32>, vector<128x32xf32>, vector<8x32xf32> -> vector<8x32xf32>
    %140 = arith.addf %136, %139 : vector<8x32xf32>
    %c0_69 = arith.constant 0 : index
    %c0_70 = arith.constant 0 : index
    %141 = vector.load %arg6[%c0_69, %c0_70] : memref<1x32xf32, #tpu.memory_space<vmem>>, vector<1x32xf32>
    %142 = vector.broadcast %141 : vector<1x32xf32> to vector<8x32xf32>
    %143 = arith.addf %140, %142 : vector<8x32xf32>
    %cst_71 = arith.constant 0.000000e+00 : f32
    %144 = vector.broadcast %cst_71 : f32 to vector<8x32xf32>
    %145 = arith.maximumf %143, %144 : vector<8x32xf32>
    %146 = vector.shape_cast %145 : vector<8x32xf32> to vector<4x2x32xf32>
    %cst_72 = arith.constant dense<0xFF800000> : vector<4x32xf32>
    %147 = vector.multi_reduction <maximumf>, %146, %cst_72 [1] : vector<4x2x32xf32> to vector<4x32xf32>
    %c0_73 = arith.constant 0 : index
    %c0_74 = arith.constant 0 : index
    %148 = vector.load %arg7[%c0_73, %c0_74] : memref<32x1xf32, #tpu.memory_space<vmem>>, vector<32x1xf32>
    %cst_75 = arith.constant dense<0.000000e+00> : vector<4x1xf32>
    %149 = tpu.matmul %147, %148, %cst_75 {dimension_numbers = #tpu.dot_dimension_numbers<[1], [0], [0], [1], [0, 0, 1, 1], [], []>} : vector<4x32xf32>, vector<32x1xf32>, vector<4x1xf32> -> vector<4x1xf32>
    %c0_76 = arith.constant 0 : index
    %c0_77 = arith.constant 0 : index
    %150 = vector.load %arg8[%c0_76, %c0_77] : memref<1x1xf32, #tpu.memory_space<vmem>>, vector<1x1xf32>
    %151 = vector.broadcast %150 : vector<1x1xf32> to vector<4x1xf32>
    %152 = arith.addf %149, %151 : vector<4x1xf32>
    %153 = vector.shape_cast %152 : vector<4x1xf32> to vector<2x2x1xf32>
    %cst_78 = arith.constant dense<0xFF800000> : vector<2x1xf32>
    %154 = vector.multi_reduction <maximumf>, %153, %cst_78 [1] : vector<2x2x1xf32> to vector<2x1xf32>
    %155 = vector.shape_cast %154 : vector<2x1xf32> to vector<2x1x1xf32>
    %156 = vector.broadcast %155 : vector<2x1x1xf32> to vector<2x2x1xf32>
    %157 = arith.subf %153, %156 : vector<2x2x1xf32>
    %158 = math.exp %157 : vector<2x2x1xf32>
    %cst_79 = arith.constant dense<0.000000e+00> : vector<2x1xf32>
    %159 = vector.multi_reduction <add>, %158, %cst_79 [1] : vector<2x2x1xf32> to vector<2x1xf32>
    %160 = vector.shape_cast %159 : vector<2x1xf32> to vector<2x1x1xf32>
    %161 = vector.broadcast %160 : vector<2x1x1xf32> to vector<2x2x1xf32>
    %162 = arith.divf %158, %161 : vector<2x2x1xf32>
    %c0_80 = arith.constant 0 : index
    %c0_81 = arith.constant 0 : index
    %c0_82 = arith.constant 0 : index
    %163 = vector.load %arg16[%c0_80, %c0_81, %c0_82] : memref<2x2x1xf32, #tpu.memory_space<vmem>>, vector<2x2x1xf32>
    tpu.vector_store %arg16[%c0_80, %c0_81, %c0_82], %162 {strides = array<i32>} : memref<2x2x1xf32, #tpu.memory_space<vmem>>, vector<2x2x1xf32>,
    %164 = vector.shape_cast %147 : vector<4x32xf32> to vector<2x2x32xf32>
    %165 = vector.broadcast %162 : vector<2x2x1xf32> to vector<2x2x32xf32>
    %166 = arith.mulf %164, %165 : vector<2x2x32xf32>
    %cst_83 = arith.constant dense<0.000000e+00> : vector<2x32xf32>
    %167 = vector.multi_reduction <add>, %166, %cst_83 [1] : vector<2x2x32xf32> to vector<2x32xf32>
    %cst_84 = arith.constant 5.000000e-01 : f32
    %168 = vector.broadcast %cst_84 : f32 to vector<2x32xf32>
    %169 = arith.mulf %167, %168 : vector<2x32xf32>
    %c0_85 = arith.constant 0 : index
    %c0_86 = arith.constant 0 : index
    %170 = vector.load %arg9[%c0_85, %c0_86] : memref<32x64xf32, #tpu.memory_space<vmem>>, vector<32x64xf32>
    %cst_87 = arith.constant dense<0.000000e+00> : vector<2x64xf32>
    %171 = tpu.matmul %169, %170, %cst_87 {dimension_numbers = #tpu.dot_dimension_numbers<[1], [0], [0], [1], [0, 0, 1, 1], [], []>} : vector<2x32xf32>, vector<32x64xf32>, vector<2x64xf32> -> vector<2x64xf32>
    %c0_88 = arith.constant 0 : index
    %c0_89 = arith.constant 0 : index
    %172 = vector.load %arg10[%c0_88, %c0_89] : memref<1x64xf32, #tpu.memory_space<vmem>>, vector<1x64xf32>
    %173 = vector.broadcast %172 : vector<1x64xf32> to vector<2x64xf32>
    %174 = arith.addf %171, %173 : vector<2x64xf32>
    %cst_90 = arith.constant 0.000000e+00 : f32
    %175 = vector.broadcast %cst_90 : f32 to vector<2x64xf32>
    %176 = arith.maximumf %174, %175 : vector<2x64xf32>
    %c0_91 = arith.constant 0 : index
    %c0_92 = arith.constant 0 : index
    %177 = vector.load %arg11[%c0_91, %c0_92] : memref<64x32xf32, #tpu.memory_space<vmem>>, vector<64x32xf32>
    %cst_93 = arith.constant dense<0.000000e+00> : vector<2x32xf32>
    %178 = tpu.matmul %176, %177, %cst_93 {dimension_numbers = #tpu.dot_dimension_numbers<[1], [0], [0], [1], [0, 0, 1, 1], [], []>} : vector<2x64xf32>, vector<64x32xf32>, vector<2x32xf32> -> vector<2x32xf32>
    %c0_94 = arith.constant 0 : index
    %c0_95 = arith.constant 0 : index
    %179 = vector.load %arg12[%c0_94, %c0_95] : memref<1x32xf32, #tpu.memory_space<vmem>>, vector<1x32xf32>
    %180 = vector.broadcast %179 : vector<1x32xf32> to vector<2x32xf32>
    %181 = arith.addf %178, %180 : vector<2x32xf32>
    %cst_96 = arith.constant 0.000000e+00 : f32
    %182 = vector.broadcast %cst_96 : f32 to vector<2x32xf32>
    %183 = arith.maximumf %181, %182 : vector<2x32xf32>
    %c0_97 = arith.constant 0 : index
    %c0_98 = arith.constant 0 : index
    %184 = vector.load %arg13[%c0_97, %c0_98] : memref<32x8xf32, #tpu.memory_space<vmem>>, vector<32x8xf32>
    %cst_99 = arith.constant dense<0.000000e+00> : vector<2x8xf32>
    %185 = tpu.matmul %183, %184, %cst_99 {dimension_numbers = #tpu.dot_dimension_numbers<[1], [0], [0], [1], [0, 0, 1, 1], [], []>} : vector<2x32xf32>, vector<32x8xf32>, vector<2x8xf32> -> vector<2x8xf32>
    %c0_100 = arith.constant 0 : index
    %c0_101 = arith.constant 0 : index
    %186 = vector.load %arg14[%c0_100, %c0_101] : memref<1x8xf32, #tpu.memory_space<vmem>>, vector<1x8xf32>
    %187 = vector.broadcast %186 : vector<1x8xf32> to vector<2x8xf32>
    %188 = arith.addf %185, %187 : vector<2x8xf32>
    %c0_102 = arith.constant 0 : index
    %c0_103 = arith.constant 0 : index
    %189 = vector.load %arg15[%c0_102, %c0_103] : memref<2x8xf32, #tpu.memory_space<vmem>>, vector<2x8xf32>
    tpu.vector_store %arg15[%c0_102, %c0_103], %188 {strides = array<i32>} : memref<2x8xf32, #tpu.memory_space<vmem>>, vector<2x8xf32>,
    return
  }
}

</mosaic_0001>

<bundles_post_ra>
// kernel: cnn_model_forward.1
= control target key start
LH: loop header
LB: loop body
LE: loop exit
PB: predicated region body
PF: predicated region fallthrough
CT: control target
= control target key end

     0   :  { %s3317_s0 = inlined_call_operand.vmem [shape: f32[32,4], index: 0, kind: input, shape index: {}]   ;;  %s3318_s1 = inlined_call_operand.vmem [shape: f32[3,4,64], index: 1, kind: input, shape index: {}]   ;;  %s3319_s2 = inlined_call_operand.vmem [shape: f32[1,64], index: 2, kind: input, shape index: {}]   ;;  %s3320_s3 = inlined_call_operand.vmem [shape: f32[3,64,128], index: 3, kind: input, shape index: {}]   ;;  %s3321_s4 = inlined_call_operand.vmem [shape: f32[1,128], index: 4, kind: input, shape index: {}]   ;;  %s3322_s5 = inlined_call_operand.vmem [shape: f32[3,128,32], index: 5, kind: input, shape index: {}]   ;;  %s3323_s6 = inlined_call_operand.vmem [shape: f32[1,32], index: 6, kind: input, shape index: {}]   ;;  %s3324_s7 = inlined_call_operand.vmem [shape: f32[32,1], index: 7, kind: input, shape index: {}]   ;;  %s3325_s8 = inlined_call_operand.<no memory space> [shape: f32[1,1], index: 8, kind: input, shape index: {}]   ;;  %s3326_s9 = inlined_call_operand.vmem [shape: f32[32,64], index: 9, kind: input, shape index: {}]   ;;  %s3327_s10 = inlined_call_operand.vmem [shape: f32[1,64], index: 10, kind: input, shape index: {}]   ;;  %s3328_s11 = inlined_call_operand.vmem [shape: f32[64,32], index: 11, kind: input, shape index: {}]   ;;  %s3329_s12 = inlined_call_operand.vmem [shape: f32[1,32], index: 12, kind: input, shape index: {}]   ;;  %s3330_s13 = inlined_call_operand.vmem [shape: f32[32,8], index: 13, kind: input, shape index: {}]   ;;  %s3331_s14 = inlined_call_operand.vmem [shape: f32[1,8], index: 14, kind: input, shape index: {}]   ;;  %s3332_s15 = inlined_call_operand.hbm [shape: f32[2,8], index: 15, kind: output, shape index: {0}]   ;;  %s3333_s16 = inlined_call_operand.vmem [shape: f32[2,2,1], index: 16, kind: output, shape index: {1}]  }
   0x1   :  { %3335 = sst [smem:[#allocation6_spill]] %s3317_s0  ;;  %v22_v0 = vstv %s3325_s8 }
   0x2   :  { %23 = vst [vmem:[#allocation2] sm:$0x1] %v22_v0 }
   0x3   :  { %v2017_v1 = vld [vmem:[%s3318_s1 + $0x4] sm:$0xf]  ;;  %vm178_vm0 = vcmask 1043456   ;;  %s3336_s27 = sld [smem:[#allocation6_spill]]  ;;  %vm165_vm1 = vcmask 31744   ;;  %v59_v4 = vlaneseq }
   0x4   :  { %2225 = vmatprep.subr.msk.mxu0 %vm178_vm0, %v2017_v1  ;;  %v162_v6 = vld [vmem:[%s3318_s1] sm:$0xf]  ;;  %v2028_v12 = vld [vmem:[%s3318_s1 + $0x8] sm:$0xf] }
   0x5   :  { %2226 = vmatpush3.msk.msra.mxu0 %vm178_vm0, %v2017_v1  ;;  %v2781_v9 = vshrl.u32 %v59_v4, 7 }
   0x6   :  { %2233 = vmatprep.subr.msk.mxu0 %vm178_vm0, %v162_v6 }
   0x7   :  { %v68_v14 = vand.u32 15, %v2781_v9  ;;  %vm120_vm2 = vcmp.lt.s32.totalorder %v2781_v9, 1  ;;  %v62_v15 = vadd.s32 16, %v2781_v9 }
   0x9   :  { %v55_v2 = vld [vmem:[%s3336_s27] sm:$0xff]  ;;  %v56_v3 = vld [vmem:[%s3336_s27 + $0x8] sm:$0xff]  ;;  %v57_v7 = vld [vmem:[%s3336_s27 + $0x10] sm:$0xff] }
   0xa   :  { %v116_v5 = vrot.slane %v55_v2, 7  ;;  %2227 = vmatprep.mubr.msk.f32.mxu0 %vm165_vm1, %v55_v2  ;;  %v58_v8 = vld [vmem:[%s3336_s27 + $0x18] sm:$0xff]  ;;  %v118_v10 = vrot.slane %v57_v7, 7  ;;  %v117_v13 = vrot.slane %v56_v3, 7 }
   0xb   :  { %2228 = vmatmul.mubr.msk.f32.vlgmr.msra.gmra.mrb[0].mxu0 %vm165_vm1, %v56_v3  ;;  %v119_v11 = vrot.slane %v58_v8, 7 }
   0xc   :  { %2234 = vmatpush3.msk.msra.mxu0 %vm178_vm0, %v162_v6  ;;  %2230 = vmatprep.mubr.msk.f32.mxu0 %vm165_vm1, %v57_v7 }
   0xd   :  { %24 = vsyncpa [#allocation4], 0  ;;  %v124_v16 = vsel %vm120_vm2, %v119_v11, %v116_v5  ;;  %2241 = vmatprep.subr.msk.mxu0 %vm178_vm0, %v2028_v12  ;;  %vm112_vm3 = vcmp.eq.s32.totalorder %v68_v14, 0  ;;  %v82_v17 = vand.u32 15, %v62_v15  ;;  %v122_v18 = vsel %vm120_vm2, %v117_v13, %v118_v10  ;;  %v2035_v37 = vld [vmem:[%s3320_s3 + $0x40] sm:$0xff]  ;;  %v2036_v38 = vld [vmem:[%s3320_s3 + $0x48] sm:$0xff] }
   0xe   :  { %v133_v19 = vsel %vm112_vm3, 0.0, %v124_v16  ;;  %v2800_v20 = vadd.s32 8, %v2781_v9  ;;  %v141_v21 = vrot.slane %v55_v2, 1  ;;  %v142_v22 = vrot.slane %v56_v3, 1  ;;  %v2037_v40 = vld [vmem:[%s3320_s3 + $0x50] sm:$0xff]  ;;  %v2038_v41 = vld [vmem:[%s3320_s3 + $0x58] sm:$0xff] }
   0xf   :  { %2231 = vmatmul.mubr.msk.f32.gmra.mrb[2].mxu0 %vm165_vm1, %v58_v8  ;;  %v123_v23 = vsel %vm120_vm2, %v116_v5, %v117_v13  ;;  %vm114_vm4 = vcmp.eq.s32.totalorder %v82_v17, 0  ;;  %v143_v24 = vrot.slane %v57_v7, 1  ;;  %v63_v27 = vadd.s32 24, %v2781_v9  ;;  %v2039_v43 = vld [vmem:[%s3320_s3 + $0x60] sm:$0xff]  ;;  %v2040_v44 = vld [vmem:[%s3320_s3 + $0x68] sm:$0xff]  ;;  %v2041_v46 = vld [vmem:[%s3320_s3 + $0x70] sm:$0xff] }
  0x10   :  { %2235 = vmatprep.mubr.msk.f32.mxu0 %vm165_vm1, %v133_v19  ;;  %v135_v25 = vsel %vm114_vm4, 0.0, %v122_v18  ;;  %v75_v26 = vand.u32 15, %v2800_v20  ;;  %vm145_vm5 = vcmp.lt.s32.totalorder %v2781_v9, 7  ;;  %v144_v28 = vrot.slane %v58_v8, 1  ;;  %v2042_v47 = vld [vmem:[%s3320_s3 + $0x78] sm:$0xff]  ;;  %v776_v49 = vld [vmem:[%s3320_s3] sm:$0xff] }
  0x11   :  { %v121_v29 = vsel %vm120_vm2, %v118_v10, %v119_v11  ;;  %v148_v30 = vsel %vm145_vm5, %v141_v21, %v142_v22  ;;  %v147_v31 = vsel %vm145_vm5, %v142_v22, %v143_v24  ;;  %v89_v32 = vand.u32 15, %v63_v27  ;;  %v777_v50 = vld [vmem:[%s3320_s3 + $0x8] sm:$0xff]  ;;  %v2058_v52 = vld [vmem:[%s3322_s5 + $0x80] sm:$0xff]  ;;  %s2671_s21 = smov [#allocation3]  }
  0x12   :  { %vm138_vm6 = vcmp.eq.s32.totalorder %v75_v26, 15  ;;  %v146_v34 = vsel %vm145_vm5, %v143_v24, %v144_v28  ;;  %v149_v35 = vsel %vm145_vm5, %v144_v28, %v141_v21  ;;  %v2463_v39 = vpack.c.bf16 %v2036_v38, %v2035_v37  ;;  %v2059_v53 = vld [vmem:[%s3322_s5 + $0x88] sm:$0xff]  ;;  %v2034_v59 = vld [vmem:[%s3319_s2] ss:$0 sm:$0xff]  ;;  %s2005_s1 = sshll.u32 %s2671_s21, 4  ;;  %s2006_s1 = int_to_ptr.vmem [resolvable:$true] %s2005_s1 }
  0x13   :  { %2236 = vmatmul.mubr.msk.f32.vlgmr.msra.gmra.mrb[0].mxu0 %vm165_vm1, %v123_v23  ;;  %v159_v33 = vsel %vm138_vm6, 0.0, %v147_v31  ;;  %vm140_vm7 = vcmp.eq.s32.totalorder %v89_v32, 15  ;;  %v2467_v42 = vpack.c.bf16 %v2038_v41, %v2037_v40  ;;  %v2471_v45 = vpack.c.bf16 %v2040_v44, %v2039_v43  ;;  %p2646_p1 = scmp.lt.s32.totalorder %s2006_s1, %s2006_s1 }
  0x14   :  { %2242 = vmatpush3.msk.msra.mxu0 %vm178_vm0, %v2028_v12  ;;  %2238 = vmatprep.mubr.msk.f32.mxu0 %vm165_vm1, %v135_v25  ;;  %v161_v36 = vsel %vm140_vm7, 0.0, %v149_v35  ;;  %v2475_v48 = vpack.c.bf16 %v2042_v47, %v2041_v46  ;;  %v2856_v51 = vpack.c.bf16 %v777_v50, %v776_v49  ;;  %v2665_v54 = vmov 0.0|0.0  }
  0x15   :  { %2464 = vmatprep.subr.bf16.mxu1 %v2463_v39  ;;  %2511 = vmatprep.subr.bf16.mxu0 %v2665_v54  ;;  %v2512_v55 = vpack.c.bf16 %v2059_v53, %v2058_v52  ;;  %v2666_v56 = vmov 1983009808   ;;  %vm576_vm8 = vcmask 517120   ;;  %vm731_vm9 = vcmask 1041409  }
  0x16   :  { %2466 = vmatpush3.bf16.msra.mxu1 %v2463_v39  ;;  %v494_v57 = vunpack.c.l.s4 %v2666_v56  ;;  %vm733_vm10 = vcmask 1042434   ;;  %vm735_vm11 = vcmask 1043459   ;;  %vm737_vm12 = vcmask 1044484  }
  0x17   :  { %2239 = vmatmul.mubr.msk.f32.gmra.mrb[2].mxu0 %vm165_vm1, %v121_v29  ;;  %2468 = vmatprep.subr.bf16.mxu1 %v2467_v42  ;;  %vm739_vm13 = vcmask 1045509   ;;  %vm741_vm14 = vcmask 1046534   ;;  %vm743_vm15 = vcmask 1047559   ;;  %vm793_vm0 = vcmask 523264  }
  0x18   :  { %2243 = vmatprep.mubr.msk.f32.mxu0 %vm165_vm1, %v148_v30  ;;  %v495_v58 = vunpack.c.0.s8 %v494_v57  ;;  %vm1101_vm6 = vcmask 1041408  }
  0x1a   :  { %2470 = vmatpush3.bf16.msra.mxu1 %v2467_v42  ;;  %v2871_v61 = vsub.s32 %v495_v58, %v2781_v9 }
  0x1b   :  { %2244 = vmatmul.mubr.msk.f32.vlgmr.msra.gmra.mrb[0].mxu0 %vm165_vm1, %v159_v33  ;;  %2472 = vmatprep.subr.bf16.mxu1 %v2471_v45 }
  0x1c   :  { %2246 = vmatprep.mubr.msk.f32.mxu0 %vm165_vm1, %v146_v34  ;;  %2513 = vmatpush3.bf16.msra.mxu0 %v2512_v55 }
  0x1d   :  { %2514 = vmatprep.subr.bf16.mxu0 %v2665_v54 }
  0x1e   :  { %2474 = vmatpush3.bf16.msra.mxu1 %v2471_v45 }
  0x1f   :  { %2247 = vmatmul.mubr.msk.f32.gmra.mrb[2].mxu0 %vm165_vm1, %v161_v36  ;;  %2476 = vmatprep.subr.bf16.mxu1 %v2475_v48 }
  0x22   :  { %2478 = vmatpush3.bf16.msra.mxu1 %v2475_v48 }
  0x23   :  { %2480 = vmatprep.subr.bf16.mxu1 %v2856_v51 }
  0xee   :  { %v2245_v60 = vpop.f32.mrb[0].mxu0 }
  0xef   :  { %v481_v62 = vadd.f32 %v2245_v60, %v2034_v59  ;;  %v450_v63 = vpop.f32.mrb[1].mxu0 }
  0xf0   :  { %v480_v0 = vadd.f32 %v2034_v59, %v450_v63 }
  0xf1   :  { %v485_v1 = vmax.f32 %v481_v62, 0.0 }
  0xf2   :  { %v484_v2 = vmax.f32 %v480_v0, 0.0  ;;  %v2248_v3 = vpop.f32.mrb[2].mxu0 }
  0xf3   :  { %v509_v4 = vcombine.high %v485_v1, %v485_v1  ;;  %v516_v5 = vrot.slane %v485_v1, %v2871_v61  ;;  %v460_v6 = vpop.f32.mrb[3].mxu0  ;;  %v483_v13 = vadd.f32 %v2248_v3, %v2034_v59 }
  0xf4   :  { %v492_v7 = vcombine.high %v484_v2, %v484_v2  ;;  %v499_v8 = vrot.slane %v484_v2, %v2871_v61  ;;  %v482_v45 = vadd.f32 %v2034_v59, %v460_v6 }
  0xf5   :  { %v523_v10 = vrot.slane %v509_v4, %v2871_v61  ;;  %v524_v11 = vcombine.high %v516_v5, %v516_v5  ;;  %v605_v12 = vsel %vm576_vm8, %v516_v5, -inf  ;;  %v487_v32 = vmax.f32 %v483_v13, 0.0 }
  0xf6   :  { %v606_v14 = vrot.slane %v605_v12, 4  ;;  %v506_v15 = vrot.slane %v492_v7, %v2871_v61  ;;  %v507_v16 = vcombine.high %v499_v8, %v499_v8  ;;  %v577_v17 = vsel %vm576_vm8, %v499_v8, -inf }
  0xf7   :  { %v525_v18 = vcombine.high %v523_v10, %v523_v10  ;;  %v612_v19 = vsel %vm576_vm8, %v524_v11, -inf  ;;  %v619_v21 = vsel %vm576_vm8, %v523_v10, -inf  ;;  %v578_v22 = vrot.slane %v577_v17, 4 }
  0xf8   :  { %v607_v23 = vmax.f32 %v605_v12, %v606_v14  ;;  %v613_v24 = vrot.slane %v612_v19, 4  ;;  %v620_v25 = vrot.slane %v619_v21, 4  ;;  %v508_v26 = vcombine.high %v506_v15, %v506_v15 }
  0xf9   :  { %v579_v27 = vmax.f32 %v577_v17, %v578_v22  ;;  %v584_v28 = vsel %vm576_vm8, %v507_v16, -inf  ;;  %v591_v29 = vsel %vm576_vm8, %v506_v15, -inf  ;;  %v626_v31 = vsel %vm576_vm8, %v525_v18, -inf }
  0xfa   :  { %v608_v30 = vrot.slane %v607_v23, 2  ;;  %v614_v33 = vmax.f32 %v612_v19, %v613_v24  ;;  %v585_v34 = vrot.slane %v584_v28, 4  ;;  %v592_v35 = vrot.slane %v591_v29, 4 }
  0xfb   :  { %v598_v36 = vsel %vm576_vm8, %v508_v26, -inf  ;;  %v621_v37 = vmax.f32 %v619_v21, %v620_v25  ;;  %v580_v38 = vrot.slane %v579_v27, 2  ;;  %v627_v43 = vrot.slane %v626_v31, 4 }
  0xfc   :  { %v609_v39 = vmax.f32 %v607_v23, %v608_v30  ;;  %v586_v40 = vmax.f32 %v584_v28, %v585_v34  ;;  %v593_v41 = vmax.f32 %v591_v29, %v592_v35  ;;  %v599_v42 = vrot.slane %v598_v36, 4 }
  0xfd   :  { %v543_v44 = vcombine.high %v487_v32, %v487_v32  ;;  %v615_v46 = vrot.slane %v614_v33, 2  ;;  %v622_v50 = vrot.slane %v621_v37, 2  ;;  %v581_v52 = vmax.f32 %v579_v27, %v580_v38 }
  0xfe   :  { %v587_v47 = vrot.slane %v586_v40, 2  ;;  %v594_v48 = vrot.slane %v593_v41, 2  ;;  %v600_v49 = vmax.f32 %v598_v36, %v599_v42  ;;  %v550_v53 = vrot.slane %v487_v32, %v2871_v61 }
  0xff   :  { %v557_v55 = vrot.slane %v543_v44, %v2871_v61  ;;  %v610_v56 = vrot.slane %v609_v39, 1  ;;  %v616_v1 = vmax.f32 %v614_v33, %v615_v46  ;;  %v582_v5 = vrot.slane %v581_v52, 1 }
 0x100   :  { %v588_v57 = vmax.f32 %v586_v40, %v587_v47  ;;  %v595_v58 = vmax.f32 %v593_v41, %v594_v48  ;;  %v601_v60 = vrot.slane %v600_v49, 2  ;;  %v558_v62 = vcombine.high %v550_v53, %v550_v53 }
 0x101   :  { %v559_v63 = vcombine.high %v557_v55, %v557_v55  ;;  %v661_v0 = vsel %vm576_vm8, %v550_v53, -inf  ;;  %v675_v59 = vsel %vm576_vm8, %v557_v55, -inf  ;;  %v486_v8 = vmax.f32 %v482_v45, 0.0 }
 0x102   :  { %v589_v2 = vrot.slane %v588_v57, 1  ;;  %v602_v3 = vmax.f32 %v600_v49, %v601_v60  ;;  %v662_v4 = vrot.slane %v661_v0, 4  ;;  %v668_v6 = vsel %vm576_vm8, %v558_v62, -inf }
 0x103   :  { %v676_v7 = vrot.slane %v675_v59, 4  ;;  %v623_v10 = vmax.f32 %v621_v37, %v622_v50  ;;  %v628_v11 = vmax.f32 %v626_v31, %v627_v43  ;;  %v596_v12 = vrot.slane %v595_v58, 1 }
 0x104   :  { %v663_v13 = vmax.f32 %v661_v0, %v662_v4  ;;  %v603_v14 = vrot.slane %v602_v3, 1  ;;  %v669_v15 = vrot.slane %v668_v6, 4  ;;  %v682_v16 = vsel %vm576_vm8, %v559_v63, -inf }
 0x105   :  { %v526_v17 = vcombine.high %v486_v8, %v486_v8  ;;  %v611_v18 = vmax.f32 %v609_v39, %v610_v56  ;;  %v617_v19 = vrot.slane %v616_v1, 1  ;;  %v590_v21 = vmax.f32 %v588_v57, %v589_v2 }
 0x106   :  { %v533_v22 = vrot.slane %v486_v8, %v2871_v61  ;;  %v583_v23 = vmax.f32 %v581_v52, %v582_v5  ;;  %v670_v24 = vmax.f32 %v668_v6, %v669_v15  ;;  %v677_v25 = vmax.f32 %v675_v59, %v676_v7 }
 0x107   :  { %v540_v26 = vrot.slane %v526_v17, %v2871_v61  ;;  %v664_v27 = vrot.slane %v663_v13, 2  ;;  %v683_v28 = vrot.slane %v682_v16, 4  ;;  %v597_v31 = vmax.f32 %v595_v58, %v596_v12 }
 0x108   :  { %v541_v29 = vcombine.high %v533_v22, %v533_v22  ;;  %v633_v30 = vsel %vm576_vm8, %v533_v22, -inf  ;;  %v604_v32 = vmax.f32 %v602_v3, %v603_v14  ;;  %v732_v35 = vsel %vm731_vm9, %v590_v21, %v583_v23 }
 0x109   :  { %v542_v33 = vcombine.high %v540_v26, %v540_v26  ;;  %v634_v34 = vrot.slane %v633_v30, 4  ;;  %v671_v36 = vrot.slane %v670_v24, 2  ;;  %v647_v38 = vsel %vm576_vm8, %v540_v26, -inf }
 0x10a   :  { %v640_v37 = vsel %vm576_vm8, %v541_v29, -inf  ;;  %v678_v39 = vrot.slane %v677_v25, 2  ;;  %v624_v42 = vrot.slane %v623_v10, 1  ;;  %v665_v43 = vmax.f32 %v663_v13, %v664_v27 }
 0x10b   :  { %v635_v40 = vmax.f32 %v633_v30, %v634_v34  ;;  %v641_v41 = vrot.slane %v640_v37, 4  ;;  %v684_v44 = vmax.f32 %v682_v16, %v683_v28  ;;  %v648_v45 = vrot.slane %v647_v38, 4  ;;  %v779_v34 = vld [vmem:[%s3320_s3 + $0x18] sm:$0xff] }
 0x10c   :  { %v654_v46 = vsel %vm576_vm8, %v542_v33, -inf  ;;  %v618_v50 = vmax.f32 %v616_v1, %v617_v19  ;;  %v672_v52 = vmax.f32 %v670_v24, %v671_v36  ;;  %v629_v55 = vrot.slane %v628_v11, 2  ;;  %v778_v33 = vld [vmem:[%s3320_s3 + $0x10] sm:$0xff] }
 0x10d   :  { %v636_v47 = vrot.slane %v635_v40, 2  ;;  %v642_v48 = vmax.f32 %v640_v37, %v641_v41  ;;  %v655_v49 = vrot.slane %v654_v46, 4  ;;  %v649_v53 = vmax.f32 %v647_v38, %v648_v45  ;;  %v1207_v45 = vld [vmem:[%s3322_s5 + $0x58] sm:$0xff] }
 0x10e   :  { %v734_v56 = vsel %vm733_vm10, %v597_v31, %v732_v35  ;;  %v625_v62 = vmax.f32 %v623_v10, %v624_v42  ;;  %v630_v0 = vmax.f32 %v628_v11, %v629_v55  ;;  %v685_v2 = vrot.slane %v684_v44, 2  ;;  %v780_v42 = vld [vmem:[%s3320_s3 + $0x20] sm:$0xff] }
 0x10f   :  { %v637_v57 = vmax.f32 %v635_v40, %v636_v47  ;;  %v643_v58 = vrot.slane %v642_v48, 2  ;;  %v656_v60 = vmax.f32 %v654_v46, %v655_v49  ;;  %v650_v63 = vrot.slane %v649_v53, 2 }
 0x110   :  { %v736_v59 = vsel %vm735_vm11, %v604_v32, %v734_v56  ;;  %v679_v1 = vmax.f32 %v677_v25, %v678_v39  ;;  %v631_v8 = vrot.slane %v630_v0, 1  ;;  %v686_v10 = vmax.f32 %v684_v44, %v685_v2  ;;  %v2049_v2 = vld [vmem:[%s3320_s3 + $0x90] sm:$0xff] }
 0x111   :  { %v638_v3 = vrot.slane %v637_v57, 1  ;;  %v644_v4 = vmax.f32 %v642_v48, %v643_v58  ;;  %v657_v5 = vrot.slane %v656_v60, 2  ;;  %v738_v6 = vsel %vm737_vm12, %v611_v18, %v736_v59  ;;  %v783_v58 = vld [vmem:[%s3320_s3 + $0x38] sm:$0xff] }
 0x112   :  { %v651_v7 = vmax.f32 %v649_v53, %v650_v63  ;;  %v740_v12 = vsel %vm739_vm13, %v618_v50, %v738_v6  ;;  %v666_v16 = vrot.slane %v665_v43, 1  ;;  %v632_v17 = vmax.f32 %v630_v0, %v631_v8  ;;  %v2048_v63 = vld [vmem:[%s3320_s3 + $0x88] sm:$0xff]  ;;  %v2053_v8 = vld [vmem:[%s3320_s3 + $0xb0] sm:$0xff] }
 0x113   :  { %v645_v13 = vrot.slane %v644_v4, 1  ;;  %v658_v14 = vmax.f32 %v656_v60, %v657_v5  ;;  %v742_v15 = vsel %vm741_vm14, %v625_v62, %v740_v12  ;;  %v673_v19 = vrot.slane %v672_v52, 1  ;;  %v2047_v62 = vld [vmem:[%s3320_s3 + $0x80] sm:$0xff]  ;;  %v2052_v6 = vld [vmem:[%s3320_s3 + $0xa8] sm:$0xff]  ;;  %v2054_v12 = vld [vmem:[%s3320_s3 + $0xb8] sm:$0xff] }
 0x114   :  { %v652_v11 = vrot.slane %v651_v7, 1  ;;  %v639_v21 = vmax.f32 %v637_v57, %v638_v3  ;;  %v680_v24 = vrot.slane %v679_v1, 1  ;;  %v744_v25 = vsel %vm743_vm15, %v632_v17, %v742_v15  ;;  %v2050_v3 = vld [vmem:[%s3320_s3 + $0x98] sm:$0xff]  ;;  %v1196_v15 = vld [vmem:[%s3322_s5] sm:$0xff] }
 0x115   :  { %v646_v22 = vmax.f32 %v644_v4, %v645_v13  ;;  %v659_v23 = vrot.slane %v658_v14, 1  ;;  %2265 = vmatprep.mubr.msk.f32.mxu1 %vm793_vm0, %v744_v25  ;;  %v687_v28 = vrot.slane %v686_v10, 1  ;;  %v667_v29 = vmax.f32 %v665_v43, %v666_v16  ;;  %v781_v43 = vld [vmem:[%s3320_s3 + $0x28] sm:$0xff]  ;;  %v2061_v17 = vld [vmem:[%s3322_s5 + $0x98] sm:$0xff] }
 0x116   :  { %v653_v18 = vmax.f32 %v651_v7, %v652_v11  ;;  %v674_v31 = vmax.f32 %v672_v52, %v673_v19  ;;  %v693_v35 = vand.u32 7, %v2781_v9  ;;  %v681_v36 = vmax.f32 %v679_v1, %v680_v24  ;;  %v2060_v11 = vld [vmem:[%s3322_s5 + $0x90] sm:$0xff]  ;;  %v2062_v24 = vld [vmem:[%s3322_s5 + $0xa0] sm:$0xff] }
 0x117   :  { %v660_v26 = vmax.f32 %v658_v14, %v659_v23  ;;  %v745_v27 = vsel %vm731_vm9, %v646_v22, %v639_v21  ;;  %v688_v38 = vmax.f32 %v686_v10, %v687_v28  ;;  %v2483_v41 = vpack.c.bf16 %v779_v34, %v778_v33  ;;  %v1197_v10 = vld [vmem:[%s3322_s5 + $0x8] sm:$0xff]  ;;  %v1198_v21 = vld [vmem:[%s3322_s5 + $0x10] sm:$0xff]  ;;  %v1199_v22 = vld [vmem:[%s3322_s5 + $0x18] sm:$0xff] }
 0x118   :  { %v746_v30 = vsel %vm733_vm10, %v653_v18, %v745_v27  ;;  %vm2925_vm1 = vcmp.eq.s32.totalorder %v693_v35, 0  ;;  %v754_v46 = vrot.slane %v744_v25, 7  ;;  %v766_v47 = vrot.slane %v744_v25, 1  ;;  %v2063_v18 = vld [vmem:[%s3322_s5 + $0xa8] sm:$0xff]  ;;  %v1203_v33 = vld [vmem:[%s3322_s5 + $0x38] sm:$0xff] }
 0x119   :  { %v747_v32 = vsel %vm735_vm11, %v660_v26, %v746_v30  ;;  %v2487_v50 = vpack.c.bf16 %v781_v43, %v780_v42  ;;  %v700_v0 = vand.u32 7, %v2800_v20  ;;  %v2495_v59 = vpack.c.bf16 %v2048_v63, %v2047_v62  ;;  %v2051_v20 = vld [vmem:[%s3320_s3 + $0xa0] sm:$0xff]  ;;  %v1201_v27 = vld [vmem:[%s3322_s5 + $0x28] sm:$0xff]  ;;  %v2065_v30 = vld [vmem:[%s3322_s5 + $0xb8] sm:$0xff] }
 0x11a   :  { %v748_v37 = vsel %vm737_vm12, %v667_v29, %v747_v32  ;;  %vm764_vm3 = vcmp.eq.s32.totalorder %v693_v35, 7  ;;  %v2499_v4 = vpack.c.bf16 %v2050_v3, %v2049_v2  ;;  %v2503_v7 = vpack.c.bf16 %v2052_v6, %v2051_v20  ;;  %v1200_v26 = vld [vmem:[%s3322_s5 + $0x20] sm:$0xff]  ;;  %v2064_v29 = vld [vmem:[%s3322_s5 + $0xb0] sm:$0xff]  ;;  %v2069_v42 = vld [vmem:[%s3322_s5 + $0xd8] sm:$0xff] }
 0x11b   :  { %v749_v39 = vsel %vm739_vm13, %v674_v31, %v748_v37  ;;  %v2507_v13 = vpack.c.bf16 %v2054_v12, %v2053_v8  ;;  %vm765_vm4 = vcmp.eq.s32.totalorder %v700_v0, 7  ;;  %v2536_v16 = vpack.c.bf16 %v1197_v10, %v1196_v15  ;;  %v1202_v32 = vld [vmem:[%s3322_s5 + $0x30] sm:$0xff]  ;;  %v2066_v35 = vld [vmem:[%s3322_s5 + $0xc0] sm:$0xff] }
 0x11c   :  { %v750_v40 = vsel %vm741_vm14, %v681_v36, %v749_v39  ;;  %v2515_v19 = vpack.c.bf16 %v2061_v17, %v2060_v11  ;;  %v2539_v23 = vpack.c.bf16 %v1199_v22, %v1198_v21  ;;  %v2518_v25 = vpack.c.bf16 %v2063_v18, %v2062_v24  ;;  %v2067_v36 = vld [vmem:[%s3322_s5 + $0xc8] sm:$0xff]  ;;  %v2057_v63 = vld [vmem:[%s3321_s4] ss:$0 sm:$0xff] }
 0x11d   :  { %v751_v44 = vsel %vm743_vm15, %v688_v38, %v750_v40  ;;  %v2542_v28 = vpack.c.bf16 %v1201_v27, %v1200_v26  ;;  %v2521_v31 = vpack.c.bf16 %v2065_v30, %v2064_v29  ;;  %v2545_v34 = vpack.c.bf16 %v1203_v33, %v1202_v32  ;;  %v1204_v38 = vld [vmem:[%s3322_s5 + $0x40] sm:$0xff]  ;;  %v1205_v39 = vld [vmem:[%s3322_s5 + $0x48] sm:$0xff] }
 0x11e   :  { %v755_v48 = vrot.slane %v751_v44, 7  ;;  %v767_v49 = vrot.slane %v751_v44, 1  ;;  %2266 = vmatmul.mubr.msk.f32.vlgmr.msra.gmra.mrb[0].mxu1 %vm793_vm0, %v751_v44  ;;  %2516 = vmatpush3.bf16.msra.mxu0 %v2515_v19  ;;  %v2524_v37 = vpack.c.bf16 %v2067_v36, %v2066_v35  ;;  %v2548_v40 = vpack.c.bf16 %v1205_v39, %v1204_v38  ;;  %v1206_v44 = vld [vmem:[%s3322_s5 + $0x50] sm:$0xff] }
 0x11f   :  { %2482 = vmatpush3.bf16.msra.mxu1 %v2856_v51  ;;  %v782_v51 = vld [vmem:[%s3320_s3 + $0x30] sm:$0xff]  ;;  %2517 = vmatprep.subr.bf16.mxu0 %v2665_v54 }
 0x120   :  { %2484 = vmatprep.subr.bf16.mxu1 %v2483_v41  ;;  %v757_v52 = vsel %vm120_vm2, %v755_v48, %v754_v46  ;;  %v756_v53 = vsel %vm120_vm2, %v754_v46, %v755_v48  ;;  %v768_v55 = vsel %vm145_vm5, %v766_v47, %v767_v49  ;;  %v769_v56 = vsel %vm145_vm5, %v767_v49, %v766_v47  ;;  %v2070_v47 = vld [vmem:[%s3322_s5 + $0xe0] sm:$0xff]  ;;  %v2071_v48 = vld [vmem:[%s3322_s5 + $0xe8] sm:$0xff] }
 0x121   :  { %v762_v57 = vsel %vm2925_vm1, 0.0, %v757_v52  ;;  %v2491_v60 = vpack.c.bf16 %v783_v58, %v782_v51  ;;  %vm714_vm2 = vcmp.eq.s32.totalorder %v700_v0, 0  ;;  %v774_v1 = vsel %vm764_vm3, 0.0, %v768_v55  ;;  %v1209_v52 = vld [vmem:[%s3322_s5 + $0x68] sm:$0xff]  ;;  %v2072_v55 = vld [vmem:[%s3322_s5 + $0xf0] sm:$0xff]  ;;  %v1211_v58 = vld [vmem:[%s3322_s5 + $0x78] sm:$0xff] }
 0x122   :  { %2284 = vmatprep.mubr.msk.f32.mxu1 %vm793_vm0, %v762_v57  ;;  %v763_v5 = vsel %vm714_vm2, 0.0, %v756_v53  ;;  %v775_v14 = vsel %vm765_vm4, 0.0, %v769_v56  ;;  %2519 = vmatpush3.bf16.msra.mxu0 %v2518_v25  ;;  %v2551_v46 = vpack.c.bf16 %v1207_v45, %v1206_v44  ;;  %v2530_v49 = vpack.c.bf16 %v2071_v48, %v2070_v47  ;;  %v2073_v56 = vld [vmem:[%s3322_s5 + $0xf8] sm:$0xff]  ;;  %v1210_v51 = vld [vmem:[%s3322_s5 + $0x70] sm:$0xff] }
 0x123   :  { %2486 = vmatpush3.bf16.msra.mxu1 %v2483_v41  ;;  %2520 = vmatprep.subr.bf16.mxu0 %v2665_v54  ;;  %v2068_v41 = vld [vmem:[%s3322_s5 + $0xd0] sm:$0xff]  ;;  %v2533_v57 = vpack.c.bf16 %v2073_v56, %v2072_v55  ;;  %vm2667_vm5 = vmmov 0   ;;  %v2557_v62 = vpack.c.bf16 %v1211_v58, %v1210_v51 }
 0x124   :  { %2488 = vmatprep.subr.bf16.mxu1 %v2487_v50  ;;  %v2527_v43 = vpack.c.bf16 %v2069_v42, %v2068_v41 }
 0x126   :  { %2522 = vmatpush3.bf16.msra.mxu0 %v2521_v31 }
 0x127   :  { %2490 = vmatpush3.bf16.msra.mxu1 %v2487_v50  ;;  %2523 = vmatprep.subr.bf16.mxu0 %v2665_v54  ;;  %v1208_v50 = vld [vmem:[%s3322_s5 + $0x60] sm:$0xff] }
 0x128   :  { %2492 = vmatprep.subr.bf16.mxu1 %v2491_v60  ;;  %v2554_v53 = vpack.c.bf16 %v1209_v52, %v1208_v50 }
 0x12a   :  { %2525 = vmatpush3.bf16.msra.mxu0 %v2524_v37 }
 0x12b   :  { %2494 = vmatpush3.bf16.msra.mxu1 %v2491_v60  ;;  %2526 = vmatprep.subr.bf16.mxu0 %v2665_v54  ;;  %v2668_v60 = vmov 0.0  }
 0x12c   :  { %2496 = vmatprep.subr.bf16.mxu1 %v2495_v59  ;;  %2338 = vmatprep.mubr.msk.f32.mxu0 %vm2667_vm5, %v2668_v60 }
 0x12e   :  { %2285 = vmatmul.mubr.msk.f32.vlgmr.msra.gmra.mrb[0].mxu1 %vm793_vm0, %v763_v5  ;;  %2528 = vmatpush3.bf16.msra.mxu0 %v2527_v43 }
 0x12f   :  { %2498 = vmatpush3.bf16.msra.mxu1 %v2495_v59  ;;  %2303 = vmatprep.mubr.msk.f32.mxu1 %vm793_vm0, %v774_v1 }
 0x130   :  { %2500 = vmatprep.subr.bf16.mxu1 %v2499_v4  ;;  %2529 = vmatprep.subr.bf16.mxu0 %v2665_v54 }
 0x132   :  { %2531 = vmatpush3.bf16.msra.mxu0 %v2530_v49 }
 0x133   :  { %2502 = vmatpush3.bf16.msra.mxu1 %v2499_v4  ;;  %2532 = vmatprep.subr.bf16.mxu0 %v2665_v54 }
 0x134   :  { %2504 = vmatprep.subr.bf16.mxu1 %v2503_v7 }
 0x136   :  { %2534 = vmatpush3.bf16.msra.mxu0 %v2533_v57 }
 0x137   :  { %2506 = vmatpush3.bf16.msra.mxu1 %v2503_v7  ;;  %2559 = vmatprep.subr.bf16.mxu0 %v2665_v54 }
 0x138   :  { %2508 = vmatprep.subr.bf16.mxu1 %v2507_v13 }
 0x13b   :  { %2510 = vmatpush3.bf16.msra.mxu1 %v2507_v13 }
 0x13c   :  { %2535 = vmatprep.subr.bf16.mxu1 %v2665_v54 }
 0x13e   :  { %2304 = vmatmul.mubr.msk.f32.vlgmr.msra.gmra.mrb[0].mxu1 %vm793_vm0, %v775_v14 }
 0x13f   :  { %2537 = vmatpush3.bf16.msra.mxu1 %v2536_v16  ;;  %2373 = vmatprep.mubr.msk.f32.mxu1 %vm2667_vm5, %v2668_v60 }
 0x140   :  { %2538 = vmatprep.subr.bf16.mxu1 %v2665_v54 }
 0x143   :  { %2540 = vmatpush3.bf16.msra.mxu1 %v2539_v23 }
 0x144   :  { %2541 = vmatprep.subr.bf16.mxu1 %v2665_v54 }
 0x147   :  { %2543 = vmatpush3.bf16.msra.mxu1 %v2542_v28 }
 0x148   :  { %2544 = vmatprep.subr.bf16.mxu1 %v2665_v54 }
 0x14b   :  { %2546 = vmatpush3.bf16.msra.mxu1 %v2545_v34 }
 0x14c   :  { %2547 = vmatprep.subr.bf16.mxu1 %v2665_v54 }
 0x14f   :  { %2549 = vmatpush3.bf16.msra.mxu1 %v2548_v40 }
 0x150   :  { %2550 = vmatprep.subr.bf16.mxu1 %v2665_v54 }
 0x153   :  { %2552 = vmatpush3.bf16.msra.mxu1 %v2551_v46 }
 0x154   :  { %2553 = vmatprep.subr.bf16.mxu1 %v2665_v54 }
 0x157   :  { %2555 = vmatpush3.bf16.msra.mxu1 %v2554_v53 }
 0x158   :  { %2556 = vmatprep.subr.bf16.mxu1 %v2665_v54 }
 0x15b   :  { %2558 = vmatpush3.bf16.msra.mxu1 %v2557_v62 }
 0x15c   :  { %2583 = vmatprep.subr.bf16.mxu1 %v2665_v54 }
 0x211   :  { %v2305_v0 = vpop.f32.mrb[0].mxu1 }
 0x212   :  { %v1054_v59 = vadd.f32 %v2305_v0, %v2057_v63  ;;  %v1035_v2 = vpop.f32.mrb[1].mxu1 }
 0x213   :  { %v1053_v3 = vadd.f32 %v2057_v63, %v1035_v2 }
 0x214   :  { %v1056_v4 = vmax.f32 %v1054_v59, 0.0 }
 0x215   :  { %v1055_v5 = vmax.f32 %v1053_v3, 0.0 }
 0x216   :  { %v1076_v20 = vcombine.high %v1056_v4, %v1056_v4  ;;  %v1083_v6 = vrot.slane %v1056_v4, %v2871_v61 }
 0x217   :  { %v1059_v1 = vcombine.high %v1055_v5, %v1055_v5  ;;  %v1066_v7 = vrot.slane %v1055_v5, %v2871_v61 }
 0x218   :  { %v1090_v8 = vrot.slane %v1076_v20, %v2871_v61  ;;  %v1091_v12 = vcombine.high %v1083_v6, %v1083_v6  ;;  %v1130_v13 = vsel %vm1101_vm6, %v1083_v6, -inf }
 0x219   :  { %v1131_v14 = vrot.slane %v1130_v13, 4  ;;  %v1073_v15 = vrot.slane %v1059_v1, %v2871_v61  ;;  %v1074_v10 = vcombine.high %v1066_v7, %v1066_v7  ;;  %v1102_v16 = vsel %vm1101_vm6, %v1066_v7, -inf }
 0x21a   :  { %v1092_v11 = vcombine.high %v1090_v8, %v1090_v8  ;;  %v1137_v17 = vsel %vm1101_vm6, %v1091_v12, -inf  ;;  %v1144_v19 = vsel %vm1101_vm6, %v1090_v8, -inf  ;;  %v1103_v21 = vrot.slane %v1102_v16, 4  ;;  %v2076_v12 = vld [vmem:[%s3322_s5 + $0x100] sm:$0xff] }
 0x21b   :  { %v1132_v22 = vmax.f32 %v1130_v13, %v1131_v14  ;;  %v1138_v23 = vrot.slane %v1137_v17, 4  ;;  %v1145_v24 = vrot.slane %v1144_v19, 4  ;;  %v1075_v18 = vcombine.high %v1073_v15, %v1073_v15  ;;  %v2077_v13 = vld [vmem:[%s3322_s5 + $0x108] sm:$0xff] }
 0x21c   :  { %v1151_v25 = vsel %vm1101_vm6, %v1092_v11, -inf  ;;  %v1104_v26 = vmax.f32 %v1102_v16, %v1103_v21  ;;  %v1109_v27 = vsel %vm1101_vm6, %v1074_v10, -inf  ;;  %v1116_v28 = vsel %vm1101_vm6, %v1073_v15, -inf }
 0x21d   :  { %v1139_v29 = vmax.f32 %v1137_v17, %v1138_v23  ;;  %v1146_v30 = vmax.f32 %v1144_v19, %v1145_v24  ;;  %v1152_v31 = vrot.slane %v1151_v25, 4  ;;  %v1110_v33 = vrot.slane %v1109_v27, 4  ;;  %v2078_v23 = vld [vmem:[%s3322_s5 + $0x110] sm:$0xff]  ;;  %v2079_v24 = vld [vmem:[%s3322_s5 + $0x118] sm:$0xff] }
 0x21e   :  { %v1105_v32 = vrot.slane %v1104_v26, 2  ;;  %v1117_v34 = vrot.slane %v1116_v28, 4  ;;  %v1123_v35 = vsel %vm1101_vm6, %v1075_v18, -inf  ;;  %v1133_v36 = vrot.slane %v1132_v22, 2 }
 0x21f   :  { %v1140_v37 = vrot.slane %v1139_v29, 2  ;;  %v1153_v38 = vmax.f32 %v1151_v25, %v1152_v31  ;;  %v1111_v40 = vmax.f32 %v1109_v27, %v1110_v33  ;;  %v1124_v42 = vrot.slane %v1123_v35, 4  ;;  %v2080_v27 = vld [vmem:[%s3322_s5 + $0x120] sm:$0xff]  ;;  %v2083_v31 = vld [vmem:[%s3322_s5 + $0x138] sm:$0xff] }
 0x220   :  { %v1106_v39 = vmax.f32 %v1104_v26, %v1105_v32  ;;  %v1118_v41 = vmax.f32 %v1116_v28, %v1117_v34  ;;  %v1147_v43 = vrot.slane %v1146_v30, 2  ;;  %v1134_v48 = vmax.f32 %v1132_v22, %v1133_v36  ;;  %v2081_v28 = vld [vmem:[%s3322_s5 + $0x128] sm:$0xff]  ;;  %v2084_v33 = vld [vmem:[%s3322_s5 + $0x140] sm:$0xff]  ;;  %v2086_v36 = vld [vmem:[%s3322_s5 + $0x150] sm:$0xff] }
 0x221   :  { %v1154_v44 = vrot.slane %v1153_v38, 2  ;;  %v1112_v45 = vrot.slane %v1111_v40, 2  ;;  %v1125_v47 = vmax.f32 %v1123_v35, %v1124_v42  ;;  %v1141_v49 = vmax.f32 %v1139_v29, %v1140_v37  ;;  %v2085_v34 = vld [vmem:[%s3322_s5 + $0x148] sm:$0xff]  ;;  %v2087_v37 = vld [vmem:[%s3322_s5 + $0x158] sm:$0xff]  ;;  %v2090_v42 = vld [vmem:[%s3322_s5 + $0x170] sm:$0xff] }
 0x222   :  { %v1119_v46 = vrot.slane %v1118_v41, 2  ;;  %v1107_v50 = vrot.slane %v1106_v39, 1  ;;  %v1148_v56 = vmax.f32 %v1146_v30, %v1147_v43  ;;  %v1135_v63 = vrot.slane %v1134_v48, 1  ;;  %v2082_v30 = vld [vmem:[%s3322_s5 + $0x130] sm:$0xff]  ;;  %v2091_v43 = vld [vmem:[%s3322_s5 + $0x178] sm:$0xff] }
 0x223   :  { %v1113_v52 = vmax.f32 %v1111_v40, %v1112_v45  ;;  %v1126_v55 = vrot.slane %v1125_v47, 2  ;;  %v1155_v57 = vmax.f32 %v1153_v38, %v1154_v44  ;;  %v1142_v0 = vrot.slane %v1141_v49, 1  ;;  %v2089_v40 = vld [vmem:[%s3322_s5 + $0x168] sm:$0xff] }
 0x224   :  { %v1120_v53 = vmax.f32 %v1118_v41, %v1119_v46  ;;  %v1108_v59 = vmax.f32 %v1106_v39, %v1107_v50  ;;  %v1149_v5 = vrot.slane %v1148_v56, 1  ;;  %v1136_v7 = vmax.f32 %v1134_v48, %v1135_v63  ;;  %v2088_v39 = vld [vmem:[%s3322_s5 + $0x160] sm:$0xff]  ;;  %v1520_v50 = vld [vmem:[%s3324_s7 + $0x18] sm:$0xff] }
 0x225   :  { %v1114_v51 = vrot.slane %v1113_v52, 1  ;;  %v1127_v62 = vmax.f32 %v1125_v47, %v1126_v55  ;;  %v1156_v1 = vrot.slane %v1155_v57, 1  ;;  %v1143_v14 = vmax.f32 %v1141_v49, %v1142_v0  ;;  %v1517_v46 = vld [vmem:[%s3324_s7] sm:$0xff]  ;;  %v1518_v47 = vld [vmem:[%s3324_s7 + $0x8] sm:$0xff]  ;;  %v1519_v49 = vld [vmem:[%s3324_s7 + $0x10] sm:$0xff] }
 0x226   :  { %v1121_v58 = vrot.slane %v1120_v53, 1  ;;  %v1162_v10 = vand.u32 3, %v2781_v9  ;;  %v1150_v16 = vmax.f32 %v1148_v56, %v1149_v5  ;;  %v2560_v21 = vpack.c.bf16 %v2077_v13, %v2076_v12 }
 0x227   :  { %v1115_v2 = vmax.f32 %v1113_v52, %v1114_v51  ;;  %v1128_v4 = vrot.slane %v1127_v62, 1  ;;  %v1157_v17 = vmax.f32 %v1155_v57, %v1156_v1  ;;  %v2563_v26 = vpack.c.bf16 %v2079_v24, %v2078_v23 }
 0x228   :  { %v1122_v3 = vmax.f32 %v1120_v53, %v1121_v58  ;;  %vm2103_vm7 = vcmp.ne.s32.totalorder %v1162_v10, 0  ;;  %v2566_v29 = vpack.c.bf16 %v2081_v28, %v2080_v27  ;;  %v2569_v32 = vpack.c.bf16 %v2083_v31, %v2082_v30 }
 0x229   :  { %v1129_v20 = vmax.f32 %v1127_v62, %v1128_v4  ;;  %v1179_v6 = vsel %vm731_vm9, %v1115_v2, %v1108_v59  ;;  %v2572_v35 = vpack.c.bf16 %v2085_v34, %v2084_v33  ;;  %v2575_v38 = vpack.c.bf16 %v2087_v37, %v2086_v36  ;;  %v2094_v62 = vld [vmem:[%s3323_s6] ss:$0 sm:$0xff] }
 0x22a   :  { %v1180_v8 = vsel %vm733_vm10, %v1122_v3, %v1179_v6  ;;  %v2578_v41 = vpack.c.bf16 %v2089_v40, %v2088_v39  ;;  %v2581_v44 = vpack.c.bf16 %v2091_v43, %v2090_v42  ;;  %vm2104_vm8 = vcmp.ne.s32.totalorder %v1162_v10, 3  ;;  %v2095_v40 = vld [vmem:[#allocation2] ss:$0 sm:$0xff] }
 0x22b   :  { %v1181_v15 = vsel %vm735_vm11, %v1129_v20, %v1180_v8  ;;  %v2584_v48 = vpack.c.bf16 %v1518_v47, %v1517_v46  ;;  %v2587_v52 = vpack.c.bf16 %v1520_v50, %v1519_v49  ;;  %v2669_v39 = vmov 0  }
 0x22c   :  { %v1182_v11 = vsel %vm737_vm12, %v1136_v7, %v1181_v15  ;;  %vm1488_vm12 = vcmask 254976   ;;  %2632 = vset.pattern.permute.xlu0 %v2669_v39 }
 0x22d   :  { %v1183_v19 = vsel %vm739_vm13, %v1143_v14, %v1182_v11  ;;  %vm1535_vm13 = vcmask 261120  }
 0x22e   :  { %v1184_v22 = vsel %vm741_vm14, %v1150_v16, %v1183_v19  ;;  %vm1619_vm14 = vcmask 1024  }
 0x22f   :  { %v1185_v18 = vsel %vm743_vm15, %v1157_v17, %v1184_v22 }
 0x230   :  { %v1187_v25 = vrot.slane %v1185_v18, 7  ;;  %2339 = vmatmul.mubr.f32.vlgmr.msra.gmra.mrb[4].mxu0 %v1185_v18  ;;  %v1192_v45 = vrot.slane %v1185_v18, 1 }
 0x231   :  { %2561 = vmatpush3.bf16.msra.mxu0 %v2560_v21  ;;  %2408 = vmatprep.mubr.msk.f32.mxu0 %vm2667_vm5, %v2668_v60 }
 0x232   :  { %2374 = vmatmul.mubr.msk.f32.vlgmr.msra.gmra.mrb[2].mxu1 %vm2103_vm7, %v1187_v25  ;;  %2562 = vmatprep.subr.bf16.mxu0 %v2665_v54 }
 0x233   :  { %2419 = vmatprep.mubr.msk.f32.mxu1 %vm2667_vm5, %v2668_v60  ;;  %2585 = vmatpush3.bf16.msra.mxu1 %v2584_v48 }
 0x234   :  { %2586 = vmatprep.subr.bf16.mxu1 %v2665_v54 }
 0x235   :  { %2564 = vmatpush3.bf16.msra.mxu0 %v2563_v26 }
 0x236   :  { %2565 = vmatprep.subr.bf16.mxu0 %v2665_v54 }
 0x237   :  { %2588 = vmatpush3.bf16.msra.mxu1 %v2587_v52 }
 0x238   :  { %2595 = vmatprep.subr.bf16.mxu1 %v2665_v54 }
 0x239   :  { %2567 = vmatpush3.bf16.msra.mxu0 %v2566_v29 }
 0x23a   :  { %2568 = vmatprep.subr.bf16.mxu0 %v2665_v54 }
 0x23d   :  { %2570 = vmatpush3.bf16.msra.mxu0 %v2569_v32 }
 0x23e   :  { %2571 = vmatprep.subr.bf16.mxu0 %v2665_v54 }
 0x241   :  { %2573 = vmatpush3.bf16.msra.mxu0 %v2572_v35 }
 0x242   :  { %2574 = vmatprep.subr.bf16.mxu0 %v2665_v54 }
 0x245   :  { %2576 = vmatpush3.bf16.msra.mxu0 %v2575_v38 }
 0x246   :  { %2577 = vmatprep.subr.bf16.mxu0 %v2665_v54 }
 0x249   :  { %2579 = vmatpush3.bf16.msra.mxu0 %v2578_v41 }
 0x24a   :  { %2580 = vmatprep.subr.bf16.mxu0 %v2665_v54 }
 0x24d   :  { %2582 = vmatpush3.bf16.msra.mxu0 %v2581_v44 }
 0x24e   :  { %2589 = vmatprep.subr.bf16.mxu0 %v2665_v54 }
 0x250   :  { %2409 = vmatmul.mubr.msk.f32.vlgmr.msra.gmra.mrb[6].mxu0 %vm2104_vm8, %v1192_v45 }
 0x251   :  { %2430 = vmatprep.mubr.msk.f32.mxu0 %vm2667_vm5, %v2668_v60 }
 0x303   :  { %v1295_v53 = vpop.f32.mrb[4].mxu0 }
 0x304   :  { %v2340_v55 = vpop.f32.mrb[5].mxu0 }
 0x305   :  { %v1365_v56 = vpop.f32.mrb[2].mxu1 }
 0x306   :  { %v1366_v57 = vadd.f32 %v1365_v56, %v1295_v53  ;;  %v2375_v51 = vpop.f32.mrb[3].mxu1 }
 0x323   :  { %v1452_v58 = vpop.f32.mrb[6].mxu0 }
 0x324   :  { %v1456_v63 = vadd.f32 %v1452_v58, %v1366_v57  ;;  %v2410_v0 = vpop.f32.mrb[7].mxu0 }
 0x326   :  { %v1464_v59 = vadd.f32 %v2094_v62, %v1456_v63 }
 0x328   :  { %v1465_v2 = vmax.f32 %v1464_v59, 0.0 }
 0x32a   :  { %v1467_v3 = vcombine.high %v1465_v2, %v1465_v2  ;;  %v1474_v4 = vrot.slane %v1465_v2, %v2871_v61 }
 0x32c   :  { %v1481_v5 = vrot.slane %v1467_v3, %v2871_v61  ;;  %v1482_v20 = vcombine.high %v1474_v4, %v1474_v4  ;;  %v1489_v6 = vsel %vm1488_vm12, %v1474_v4, -inf }
 0x32d   :  { %v1490_v1 = vrot.slane %v1489_v6, 4 }
 0x32e   :  { %v1483_v7 = vcombine.high %v1481_v5, %v1481_v5  ;;  %v1496_v8 = vsel %vm1488_vm12, %v1482_v20, -inf  ;;  %v1503_v12 = vsel %vm1488_vm12, %v1481_v5, -inf }
 0x32f   :  { %v1491_v13 = vmax.f32 %v1489_v6, %v1490_v1  ;;  %v1497_v14 = vrot.slane %v1496_v8, 4  ;;  %v1504_v15 = vrot.slane %v1503_v12, 4 }
 0x330   :  { %v1510_v10 = vsel %vm1488_vm12, %v1483_v7, -inf }
 0x331   :  { %v1492_v16 = vrot.slane %v1491_v13, 2  ;;  %v1498_v11 = vmax.f32 %v1496_v8, %v1497_v14  ;;  %v1505_v17 = vmax.f32 %v1503_v12, %v1504_v15  ;;  %v1511_v19 = vrot.slane %v1510_v10, 4 }
 0x333   :  { %v1493_v21 = vmax.f32 %v1491_v13, %v1492_v16  ;;  %v1499_v22 = vrot.slane %v1498_v11, 2  ;;  %v1506_v23 = vrot.slane %v1505_v17, 2  ;;  %v1512_v24 = vmax.f32 %v1510_v10, %v1511_v19 }
 0x335   :  { %v1494_v18 = vrot.slane %v1493_v21, 1  ;;  %v1500_v25 = vmax.f32 %v1498_v11, %v1499_v22  ;;  %v1507_v26 = vmax.f32 %v1505_v17, %v1506_v23  ;;  %v1513_v27 = vrot.slane %v1512_v24, 2 }
 0x337   :  { %v1501_v28 = vrot.slane %v1500_v25, 1  ;;  %v1508_v29 = vrot.slane %v1507_v26, 1  ;;  %v1514_v30 = vmax.f32 %v1512_v24, %v1513_v27  ;;  %v3194_v31 = vmax.f32 %v1493_v21, %v1494_v18  ;;  %v1736_v18 = vld [vmem:[%s3326_s9] sm:$0xff] }
 0x339   :  { %v3196_v32 = vmax.f32 %v1500_v25, %v1501_v28  ;;  %v3198_v33 = vmax.f32 %v1507_v26, %v1508_v29  ;;  %v1515_v34 = vrot.slane %v1514_v30, 1  ;;  %v1737_v25 = vld [vmem:[%s3326_s9 + $0x8] sm:$0xff]  ;;  %v1738_v26 = vld [vmem:[%s3326_s9 + $0x10] sm:$0xff]  ;;  %v1739_v28 = vld [vmem:[%s3326_s9 + $0x18] sm:$0xff] }
 0x33a   :  { %v2590_v27 = vpack.c.bf16 %v1737_v25, %v1736_v18  ;;  %v2593_v29 = vpack.c.bf16 %v1739_v28, %v1738_v26  ;;  %v1915_v25 = vld [vmem:[%s3330_s13 + $0x10] sm:$0xff]  ;;  %v1916_v26 = vld [vmem:[%s3330_s13 + $0x18] sm:$0xff] }
 0x33b   :  { %v3200_v35 = vmax.f32 %v1514_v30, %v1515_v34  ;;  %v1532_v36 = vsel %vm731_vm9, %v3196_v32, %v3194_v31  ;;  %v1824_v30 = vld [vmem:[%s3328_s11] sm:$0xff]  ;;  %v1825_v34 = vld [vmem:[%s3328_s11 + $0x8] sm:$0xff] }
 0x33c   :  { %v1533_v37 = vsel %vm733_vm10, %v3198_v33, %v1532_v36  ;;  %2591 = vmatpush3.bf16.msra.mxu0 %v2590_v27  ;;  %v1826_v36 = vld [vmem:[%s3328_s11 + $0x10] sm:$0xff]  ;;  %v2611_v27 = vpack.c.bf16 %v1916_v26, %v1915_v25 }
 0x33d   :  { %v1534_v38 = vsel %vm735_vm11, %v3200_v35, %v1533_v37  ;;  %2592 = vmatprep.subr.bf16.mxu0 %v2665_v54  ;;  %v2596_v37 = vpack.c.bf16 %v1825_v34, %v1824_v30 }
 0x33e   :  { %2420 = vmatmul.mubr.msk.f32.vlgmr.msra.gmra.mrb[4].mxu1 %vm1535_vm13, %v1534_v38  ;;  %v1827_v38 = vld [vmem:[%s3328_s11 + $0x18] sm:$0xff] }
 0x33f   :  { %2449 = vmatprep.mubr.msk.f32.mxu1 %vm2667_vm5, %v2668_v60  ;;  %2597 = vmatpush3.bf16.msra.mxu1 %v2596_v37  ;;  %v2599_v39 = vpack.c.bf16 %v1827_v38, %v1826_v36  ;;  %v2101_v36 = vld [vmem:[%s3331_s14] ss:$0 sm:$0xff] }
 0x340   :  { %2594 = vmatpush3.bf16.msra.mxu0 %v2593_v29  ;;  %2598 = vmatprep.subr.bf16.mxu1 %v2665_v54 }
 0x341   :  { %2607 = vmatprep.subr.bf16.mxu0 %v2665_v54 }
 0x343   :  { %2600 = vmatpush3.bf16.msra.mxu1 %v2599_v39 }
 0x344   :  { %2601 = vmatprep.subr.bf16.mxu1 %v2665_v54 }
 0x411   :  { %v1604_v41 = vpop.f32.mrb[4].mxu1 }
 0x412   :  { %v1605_v42 = vadd.f32 %v2095_v40, %v1604_v41  ;;  %v2421_v43 = vpop.f32.mrb[5].mxu1  ;;  %v1828_v40 = vld [vmem:[%s3328_s11 + $0x20] sm:$0xff]  ;;  %v1829_v41 = vld [vmem:[%s3328_s11 + $0x28] sm:$0xff] }
 0x413   :  { %v2670_v43 = vmov 269488144  }
 0x414   :  { %v1615_v44 = vrot.slane %v1605_v42, %v2871_v61  ;;  %v2602_v42 = vpack.c.bf16 %v1829_v41, %v1828_v40 }
 0x416   :  { %v1616_v45 = vcombine.high %v1615_v44, %v1615_v44  ;;  %v1620_v46 = vsel %vm1619_vm14, %v1615_v44, -inf  ;;  %2603 = vmatpush3.bf16.msra.mxu1 %v2602_v42 }
 0x417   :  { %v1621_v47 = vrot.slane %v1620_v46, 4  ;;  %2604 = vmatprep.subr.bf16.mxu1 %v2665_v54 }
 0x418   :  { %v1627_v48 = vsel %vm1619_vm14, %v1616_v45, -inf }
 0x419   :  { %v1622_v49 = vmax.f32 %v1620_v46, %v1621_v47  ;;  %v1628_v50 = vrot.slane %v1627_v48, 4 }
 0x41b   :  { %v1623_v52 = vrot.slane %v1622_v49, 2  ;;  %v1629_v53 = vmax.f32 %v1627_v48, %v1628_v50 }
 0x41d   :  { %v1624_v55 = vmax.f32 %v1622_v49, %v1623_v52  ;;  %v1630_v56 = vrot.slane %v1629_v53, 2 }
 0x41f   :  { %v1625_v57 = vrot.slane %v1624_v55, 1  ;;  %v1631_v51 = vmax.f32 %v1629_v53, %v1630_v56 }
 0x421   :  { %v1626_v58 = vmax.f32 %v1624_v55, %v1625_v57  ;;  %v1632_v62 = vrot.slane %v1631_v51, 1 }
 0x423   :  { %v1633_v63 = vmax.f32 %v1631_v51, %v1632_v62  ;;  %v1634_v0 = vsub.f32 %v1615_v44, %v1626_v58  ;;  %v1666_v44 = vunpack.c.l.s4 %v2670_v43 }
 0x425   :  { %v1635_v59 = vsub.f32 %v1616_v45, %v1633_v63  ;;  %v1636_v2 = vmul.f32 1.442695, %v1634_v0  ;;  %v1667_v45 = vunpack.c.0.s8 %v1666_v44 }
 0x427   :  { %2633 = vpow2.f32 %v1636_v2  ;;  %v1638_v3 = vmul.f32 1.442695, %v1635_v59  ;;  %v1670_v46 = vsub.s32 %v1667_v45, %v2781_v9 }
 0x429   :  { %2635 = vpow2.f32 %v1638_v3 }
 0x431   :  { %v2634_v4 = vpop.eup %2633 }
 0x432   :  { %v1640_v5 = vsel %vm1619_vm14, %v2634_v4, 0.0 }
 0x433   :  { %v2636_v20 = vpop.eup %2635  ;;  %v1641_v6 = vrot.slane %v1640_v5, 4 }
 0x434   :  { %v1647_v1 = vsel %vm1619_vm14, %v2636_v20, 0.0 }
 0x435   :  { %v1648_v7 = vrot.slane %v1647_v1, 4  ;;  %v1642_v8 = vadd.f32 %v1641_v6, %v1640_v5 }
 0x437   :  { %v1649_v12 = vadd.f32 %v1648_v7, %v1647_v1  ;;  %v1643_v13 = vrot.slane %v1642_v8, 2 }
 0x439   :  { %v1650_v14 = vrot.slane %v1649_v12, 2  ;;  %v1644_v15 = vadd.f32 %v1643_v13, %v1642_v8 }
 0x43b   :  { %v1651_v10 = vadd.f32 %v1650_v14, %v1649_v12  ;;  %v1645_v16 = vrot.slane %v1644_v15, 1 }
 0x43d   :  { %v1652_v11 = vrot.slane %v1651_v10, 1  ;;  %v1646_v17 = vadd.f32 %v1645_v16, %v1644_v15  ;;  %v1831_v16 = vld [vmem:[%s3328_s11 + $0x38] sm:$0xff] }
 0x43f   :  { %v1653_v19 = vadd.f32 %v1652_v11, %v1651_v10  ;;  %2637 = vrcp.f32 %v1646_v17  ;;  %v1830_v10 = vld [vmem:[%s3328_s11 + $0x30] sm:$0xff]  ;;  %v1913_v17 = vld [vmem:[%s3330_s13] sm:$0xff] }
 0x440   :  { %v2605_v11 = vpack.c.bf16 %v1831_v16, %v1830_v10 }
 0x441   :  { %2639 = vrcp.f32 %v1653_v19  ;;  %v1914_v19 = vld [vmem:[%s3330_s13 + $0x8] sm:$0xff]  ;;  %s2641_s13 = scalar_lea.vmem %s2006_s1, 32 }
 0x442   :  { %2606 = vmatpush3.bf16.msra.mxu1 %v2605_v11  ;;  %p2642_p0 = scmp.ne.s32.totalorder %s2006_s1, %s2641_s13  ;;  %p2647_p2 = scmp.lt.s32.totalorder %s2641_s13, %s2641_s13 }
 0x444   :  { %p2648_p3 = por %p2647_p2, %p2646_p1 }
 0x446   :  { %p2649_p4 = pnand %p2648_p3, %p2642_p0 }
 0x449   :  { %v2638_v21 = vpop.eup %2637 }
 0x44a   :  { %v1655_v22 = vmul.f32 %v2638_v21, %v2634_v4  ;;  %v2608_v21 = vpack.c.bf16 %v1914_v19, %v1913_v17 }
 0x44b   :  { %v2640_v23 = vpop.eup %2639 }
 0x44c   :  { %v1657_v24 = vmul.f32 %v2640_v23, %v2636_v20  ;;  %1658 = vst.msk [vmem:[%s3333_s16] sm:$0x3] %vm1619_vm14, %v1655_v22 }
 0x44e   :  { %1674 = vperm.xlu0 %2632, %v1657_v24   ;;  %1659 = vst.msk [vmem:[%s3333_s16 + $0x2] sm:$0x3] %vm1619_vm14, %v1657_v24 }
 0x452   :  { %1662 = vperm.xlu0 %2632, %v1655_v22  }
 0x4cd   :  { %v1675_v47 = vpop.permute.xlu0 %1674 }
 0x4ce   :  { %v1683_v48 = vrot.slane %v1675_v47, %v1670_v46 }
 0x4d0   :  { %v1699_v49 = vrot.slane %v1683_v48, %v2871_v61 }
 0x4d1   :  { %v1663_v50 = vpop.permute.xlu0 %1662 }
 0x4d2   :  { %v1701_v52 = vrot.slane %v1699_v49, 1  ;;  %v1671_v53 = vrot.slane %v1663_v50, %v1670_v46  ;;  %v1708_v57 = vmul.f32 %v1699_v49, %v3198_v33 }
 0x4d4   :  { %v1709_v55 = vmul.f32 %v1701_v52, %v3200_v35  ;;  %v1692_v56 = vrot.slane %v1671_v53, %v2871_v61 }
 0x4d6   :  { %v1716_v51 = vrot.slane %v1709_v55, 7  ;;  %v1700_v58 = vrot.slane %v1692_v56, 1  ;;  %v1706_v59 = vmul.f32 %v1692_v56, %v3194_v31 }
 0x4d8   :  { %v1717_v62 = vsel %vm731_vm9, %v1716_v51, %v1708_v57  ;;  %v1707_v63 = vmul.f32 %v1700_v58, %v3196_v32 }
 0x4d9   :  { %v1727_v9 = vsel %vm1488_vm12, %v1717_v62, 0.0 }
 0x4da   :  { %v1728_v0 = vrot.slane %v1727_v9, 4  ;;  %v1714_v2 = vrot.slane %v1707_v63, 7 }
 0x4dc   :  { %v1729_v3 = vadd.f32 %v1728_v0, %v1727_v9  ;;  %v1715_v4 = vsel %vm731_vm9, %v1714_v2, %v1706_v59 }
 0x4dd   :  { %v1720_v35 = vsel %vm1488_vm12, %v1715_v4, 0.0 }
 0x4de   :  { %v1730_v61 = vrot.slane %v1729_v3, 2  ;;  %v1721_v5 = vrot.slane %v1720_v35, 4 }
 0x4e0   :  { %v1731_v33 = vadd.f32 %v1730_v61, %v1729_v3  ;;  %v1722_v20 = vadd.f32 %v1721_v5, %v1720_v35 }
 0x4e2   :  { %v1723_v6 = vrot.slane %v1722_v20, 2  ;;  %v1732_v1 = vrot.slane %v1731_v33, 1 }
 0x4e4   :  { %v1724_v7 = vadd.f32 %v1723_v6, %v1722_v20  ;;  %v1733_v8 = vadd.f32 %v1732_v1, %v1731_v33 }
 0x4e6   :  { %v1725_v32 = vrot.slane %v1724_v7, 1  ;;  %v1735_v12 = vmul.f32 0.5, %v1733_v8 }
 0x4e8   :  { %v1726_v13 = vadd.f32 %v1725_v32, %v1724_v7  ;;  %v1749_v15 = vrot.slane %v1735_v12, 7 }
 0x4ea   :  { %v1734_v14 = vmul.f32 0.5, %v1726_v13 }
 0x4ec   :  { %v1750_v31 = vsel %vm731_vm9, %v1749_v15, %v1734_v14  ;;  %vm1997_vm9 = vcmask 58368  }
 0x4ed   :  { %2431 = vmatmul.mubr.msk.f32.vlgmr.msra.gmra.mrb[8].mxu0 %vm1535_vm13, %v1750_v31 }
 0x4ee   :  { %2460 = vmatprep.mubr.msk.f32.mxu0 %vm2667_vm5, %v2668_v60  ;;  %2609 = vmatpush3.bf16.msra.mxu0 %v2608_v21  ;;  %v2097_v60 = vld [vmem:[%s3327_s10] ss:$0 sm:$0xff] }
 0x4ef   :  { %2610 = vmatprep.subr.bf16.mxu0 %v2665_v54  ;;  %v2099_v54 = vld [vmem:[%s3329_s12] ss:$0 sm:$0xff] }
 0x4f2   :  { %2612 = vmatpush3.bf16.msra.mxu0 %v2611_v27 }
 0x5c0   :  { %v1819_v22 = vpop.f32.mrb[8].mxu0 }
 0x5c1   :  { %v1820_v23 = vadd.f32 %v2097_v60, %v1819_v22  ;;  %v2432_v24 = vpop.f32.mrb[9].mxu0 }
 0x5c3   :  { %v1823_v18 = vmax.f32 %v1820_v23, 0.0 }
 0x5c5   :  { %2450 = vmatmul.mubr.msk.f32.vlgmr.msra.gmra.mrb[6].mxu1 %vm793_vm0, %v1823_v18 }
 0x698   :  { %v1908_v28 = vpop.f32.mrb[6].mxu1 }
 0x699   :  { %v1909_v29 = vadd.f32 %v2099_v54, %v1908_v28  ;;  %v2451_v30 = vpop.f32.mrb[7].mxu1 }
 0x69b   :  { %v1912_v34 = vmax.f32 %v1909_v29, 0.0 }
 0x69d   :  { %2461 = vmatmul.mubr.msk.f32.vlgmr.msra.gmra.mrb[10].mxu0 %vm1535_vm13, %v1912_v34 }
 0x770   :  { %v1993_v37 = vpop.f32.mrb[10].mxu0 }
 0x771   :  { %v1994_v38 = vadd.f32 %v2101_v36, %v1993_v37  ;;  %v2462_v39 = vpop.f32.mrb[11].mxu0 }
 0x773   :  { %1998 = vst.msk [vmem:[#allocation3] sm:$0x3] %vm1997_vm9, %v1994_v38 }
 0x774   :  { %2652 = shalt.err (!%p2649_p4)
}
 0x775   :  { %s2653_s9 = scalar_lea.hbm %s3332_s15, 32 }
 0x776   :  { %p2654_p5 = scmp.ne.s32.totalorder %s3332_s15, %s2653_s9  ;;  %p2657_p6 = scmp.lt.u32.totalorder %s2653_s9, %s3332_s15 }
 0x778   :  { %p2659_p7 = pnand %p2657_p6, %p2654_p5 }
 0x77a   :  { %2662 = shalt.err (!%p2659_p7)
}
 0x77b   :  { %2008 = dma.vmem_to_hbm [thread:$0]  %s2006_s1, 32, %s3332_s15, [#allocation4]  }
 0x77c   :  { %2663 = dma.done.wait [#allocation4], 32  }
 0x77d   :  { %2664 = vsyncadd [#allocation4], 4294967264 }
 0x77e   :  { %2016 = vsyncpa [#allocation4], 1 }

</bundles_post_ra>
